<compile_context>
chip_gen: v6e
topology: v6e:2x2x1
jax: 0.10.0
libtpu: 0.0.40
codegen_flags: <defaults>
</compile_context>

<pallas_src>
import math
import functools

import jax
import jax.numpy as jnp
from jax.experimental import pallas as pl
from jax.experimental.pallas import tpu as pltpu


_LOG3 = math.log(3.0)
_INV_SQRT_2PI = 1.0 / math.sqrt(2.0 * math.pi)


def _ln(x, gamma, beta, eps=1e-5):
    mu = jnp.mean(x, axis=-1, keepdims=True)
    var = jnp.mean(jnp.square(x - mu), axis=-1, keepdims=True)
    return (x - mu) * jax.lax.rsqrt(var + eps) * gamma + beta


# ----------------------------------------------------------------------------
# Kernel 1: DataEmbedding  (circular conv1d k=3 + positional embedding)
# ----------------------------------------------------------------------------
def _embed_kernel(xm1_ref, x_ref, xp1_ref, w_ref, pe_ref, o_ref):
    # tok[i] = x[i-1] @ W_tap0 + x[i] @ W_tap1 + x[i+1] @ W_tap2  (circular)
    tok = (
        jnp.dot(xm1_ref[0], w_ref[0], preferred_element_type=jnp.float32)
        + jnp.dot(x_ref[0], w_ref[1], preferred_element_type=jnp.float32)
        + jnp.dot(xp1_ref[0], w_ref[2], preferred_element_type=jnp.float32)
    )
    o_ref[0] = tok + pe_ref[...]


def data_embedding(x, emb_w, pe):
    B, L, Cin = x.shape
    D = emb_w.shape[-1]
    # circular shifts (cheap XLA ops on the tiny raw input; the big (B,L,3Cin)
    # im2col tensor and the separate PE-add op are never materialized)
    xm1 = jnp.roll(x, 1, axis=1)
    xp1 = jnp.roll(x, -1, axis=1)
    return pl.pallas_call(
        _embed_kernel,
        out_shape=jax.ShapeDtypeStruct((B, L, D), jnp.float32),
        grid=(B,),
        in_specs=[
            pl.BlockSpec((1, L, Cin), lambda b: (b, 0, 0)),
            pl.BlockSpec((1, L, Cin), lambda b: (b, 0, 0)),
            pl.BlockSpec((1, L, Cin), lambda b: (b, 0, 0)),
            pl.BlockSpec((3, Cin, D), lambda b: (0, 0, 0)),
            pl.BlockSpec((L, D), lambda b: (0, 0)),
        ],
        out_specs=pl.BlockSpec((1, L, D), lambda b: (b, 0, 0)),
        compiler_params=pltpu.CompilerParams(dimension_semantics=("parallel",)),
    )(xm1, x, xp1, emb_w, pe)


# ----------------------------------------------------------------------------
# Kernel 2: fused QKV/sigma projection + anomaly attention (all heads per step)
# ----------------------------------------------------------------------------
def _attn_layer_kernel(x_ref, w_ref, b_ref,
                       out_ref, series_ref, prior_ref, sigma_ref,
                       *, n_heads, d_model, scale):
    x = x_ref[0]                                   # (L, D)
    L = x.shape[0]
    dh = d_model // n_heads

    # Fused Q/K/V/sigma projection: one (L, D) @ (D, 3D+H) matmul.
    qkvs = jnp.dot(x, w_ref[...], preferred_element_type=jnp.float32) + b_ref[...]

    # |i - j| generated in-kernel (no HBM input / DMA stream for it).
    row = jax.lax.broadcasted_iota(jnp.int32, (L, L), 0).astype(jnp.float32)
    col = jax.lax.broadcasted_iota(jnp.int32, (L, L), 1).astype(jnp.float32)
    neg_half_d2 = -0.5 * jnp.square(row - col)

    # sigma transform for all heads at once: sigmoid(5x)+1e-5 ; 3**s - 1
    sig_all = qkvs[:, 3 * d_model:3 * d_model + n_heads]            # (L, H)
    s_all = jnp.exp((jax.nn.sigmoid(sig_all * 5.0) + 1e-5) * _LOG3) - 1.0
    inv_s_all = pl.reciprocal(s_all, approx=True)                   # (L, H), EUP

    for h in range(n_heads):
        q = qkvs[:, h * dh:(h + 1) * dh]
        k = qkvs[:, d_model + h * dh:d_model + (h + 1) * dh]
        v = qkvs[:, 2 * d_model + h * dh:2 * d_model + (h + 1) * dh]

        # scores = q @ k^T * scale (contract head dim, no explicit transpose)
        scores = jax.lax.dot_general(
            q, k, (((1,), (1,)), ((), ())), preferred_element_type=jnp.float32
        ) * scale

        # series = softmax(scores, axis=-1)   (dropout p=0.0 -> identity)
        scores = scores - jnp.max(scores, axis=-1, keepdims=True)
        e = jnp.exp(scores)
        series = e * pl.reciprocal(jnp.sum(e, axis=-1, keepdims=True), approx=True)

        # Gaussian prior over |i-j|; divisions only on (L,1), not (L,L)
        inv_s = inv_s_all[:, h:h + 1]                               # (L, 1)
        prior = (_INV_SQRT_2PI * inv_s) * jnp.exp(neg_half_d2 * jnp.square(inv_s))

        # lane-dense attention output: heads written side by side as (L, H*Dh)
        out_ref[0, :, h * dh:(h + 1) * dh] = jnp.dot(
            series, v, preferred_element_type=jnp.float32)
        series_ref[0, h] = series
        prior_ref[0, h] = prior
        sigma_ref[0, h] = s_all[:, h:h + 1]        # per-row sigma, no LxL broadcast


def attention_layer(x, wqkvs, bqkvs, n_heads):
    B, L, D = x.shape
    H = n_heads
    dh = D // H
    F = wqkvs.shape[1]                             # 3*D + H
    scale = 1.0 / math.sqrt(dh)
    kernel = functools.partial(_attn_layer_kernel, n_heads=H, d_model=D, scale=scale)
    return pl.pallas_call(
        kernel,
        out_shape=(
            jax.ShapeDtypeStruct((B, L, D), jnp.float32),    # attn out, (B, L, H*Dh)
            jax.ShapeDtypeStruct((B, H, L, L), jnp.float32), # series
            jax.ShapeDtypeStruct((B, H, L, L), jnp.float32), # prior
            jax.ShapeDtypeStruct((B, H, L, 1), jnp.float32), # sigma (un-broadcast)
        ),
        grid=(B,),
        in_specs=[
            pl.BlockSpec((1, L, D), lambda b: (b, 0, 0)),
            pl.BlockSpec((D, F), lambda b: (0, 0)),
            pl.BlockSpec((1, F), lambda b: (0, 0)),
        ],
        out_specs=(
            pl.BlockSpec((1, L, D), lambda b: (b, 0, 0)),
            pl.BlockSpec((1, H, L, L), lambda b: (b, 0, 0, 0)),
            pl.BlockSpec((1, H, L, L), lambda b: (b, 0, 0, 0)),
            pl.BlockSpec((1, H, L, 1), lambda b: (b, 0, 0, 0)),
        ),
        compiler_params=pltpu.CompilerParams(dimension_semantics=("parallel",)),
    )(x, wqkvs, bqkvs)


# ----------------------------------------------------------------------------
# Kernel 3: output projection + residual + LN + FFN(gelu) + LN (fused)
# ----------------------------------------------------------------------------
def _encoder_layer_kernel(x_ref, a_ref, wo_ref, w1_ref, w2_ref, vec_ref, o_ref,
                          *, d_model, d_ff):
    x = x_ref[0]                                   # (L, D)
    a = a_ref[0]                                   # (L, D) raw multi-head output
    bo = vec_ref[0:1, 0:d_model]
    b1 = vec_ref[1:2, 0:d_ff]
    b2 = vec_ref[2:3, 0:d_model]
    g1 = vec_ref[3:4, 0:d_model]
    be1 = vec_ref[4:5, 0:d_model]
    g2 = vec_ref[5:6, 0:d_model]
    be2 = vec_ref[6:7, 0:d_model]

    # AttentionLayer.out_projection folded in here
    new_x = jnp.dot(a, wo_ref[...], preferred_element_type=jnp.float32) + bo
    x1 = _ln(x + new_x, g1, be1)
    y = jnp.dot(x1, w1_ref[...], preferred_element_type=jnp.float32) + b1
    # exact (erf) GELU, matching torch.nn.functional.gelu default
    y = 0.5 * y * (1.0 + jax.lax.erf(y * (1.0 / math.sqrt(2.0))))
    y = jnp.dot(y, w2_ref[...], preferred_element_type=jnp.float32) + b2
    o_ref[0] = _ln(x1 + y, g2, be2)


def encoder_layer(x, attn_raw, wo, w1, w2, vecs):
    B, L, D = x.shape
    Dff = w1.shape[1]
    V = vecs.shape[1]
    kernel = functools.partial(_encoder_layer_kernel, d_model=D, d_ff=Dff)
    return pl.pallas_call(
        kernel,
        out_shape=jax.ShapeDtypeStruct((B, L, D), jnp.float32),
        grid=(B,),
        in_specs=[
            pl.BlockSpec((1, L, D), lambda b: (b, 0, 0)),
            pl.BlockSpec((1, L, D), lambda b: (b, 0, 0)),
            pl.BlockSpec((D, D), lambda b: (0, 0)),
            pl.BlockSpec((D, Dff), lambda b: (0, 0)),
            pl.BlockSpec((Dff, D), lambda b: (0, 0)),
            pl.BlockSpec((8, V), lambda b: (0, 0)),
        ],
        out_specs=pl.BlockSpec((1, L, D), lambda b: (b, 0, 0)),
        compiler_params=pltpu.CompilerParams(dimension_semantics=("parallel",)),
    )(x, attn_raw, wo, w1, w2, vecs)


# ----------------------------------------------------------------------------
# Kernel 4: final LayerNorm + projection (fused)
# ----------------------------------------------------------------------------
def _final_norm_proj_kernel(x_ref, g_ref, b_ref, w_ref, pb_ref, o_ref):
    xn = _ln(x_ref[0], g_ref[...], b_ref[...])
    o_ref[0] = jnp.dot(xn, w_ref[...], preferred_element_type=jnp.float32) + pb_ref[...]


def final_norm_proj(x, gamma, beta, proj_w, proj_b):
    B, L, D = x.shape
    C = proj_w.shape[1]
    return pl.pallas_call(
        _final_norm_proj_kernel,
        out_shape=jax.ShapeDtypeStruct((B, L, C), jnp.float32),
        grid=(B,),
        in_specs=[
            pl.BlockSpec((1, L, D), lambda b: (b, 0, 0)),
            pl.BlockSpec((1, D), lambda b: (0, 0)),
            pl.BlockSpec((1, D), lambda b: (0, 0)),
            pl.BlockSpec((D, C), lambda b: (0, 0)),
            pl.BlockSpec((1, C), lambda b: (0, 0)),
        ],
        out_specs=pl.BlockSpec((1, L, C), lambda b: (b, 0, 0)),
        compiler_params=pltpu.CompilerParams(dimension_semantics=("parallel",)),
    )(x, gamma.reshape(1, D), beta.reshape(1, D), proj_w, proj_b.reshape(1, C))


# ----------------------------------------------------------------------------
# Parameter init (deterministic, synthetic) — weights stored pre-fused/packed
# ----------------------------------------------------------------------------
def init_params(key, enc_in, d_model, n_heads, d_ff, c_out, e_layers):
    def nrm(k, shape, scale=0.02):
        return scale * jax.random.normal(k, shape, dtype=jnp.float32)

    vmax = max(d_model, d_ff)

    def pad_row(v):
        return jnp.pad(v, (0, vmax - v.shape[0]))

    keys = jax.random.split(key, 2 + e_layers)
    params = {
        # TokenEmbedding: Conv1d(enc_in -> d_model, k=3, circular pad, bias=False)
        # stored as (k, in, out).  NOTE: a real torch checkpoint is (out, in, k)
        # and must be permuted to (k, in, out) when importing.
        "emb_w": nrm(keys[0], (3, enc_in, d_model)),
        "norm_g": jnp.ones((d_model,), jnp.float32),
        "norm_b": jnp.zeros((d_model,), jnp.float32),
        "proj_w": nrm(keys[1], (d_model, c_out)),
        "proj_b": jnp.zeros((c_out,), jnp.float32),
        "layers": [],
    }
    zD = jnp.zeros((d_model,), jnp.float32)
    zF = jnp.zeros((d_ff,), jnp.float32)
    oD = jnp.ones((d_model,), jnp.float32)
    for li in range(e_layers):
        ks = jax.random.split(keys[2 + li], 7)
        wq = nrm(ks[0], (d_model, d_model))
        wk = nrm(ks[1], (d_model, d_model))
        wv = nrm(ks[2], (d_model, d_model))
        wsig = nrm(ks[3], (d_model, n_heads))
        wqkvs = jnp.concatenate([wq, wk, wv, wsig], axis=1)        # (D, 3D+H)
        bqkvs = jnp.zeros((1, 3 * d_model + n_heads), jnp.float32)
        # packed per-layer vectors: [bo, b1, b2, g1, be1, g2, be2, pad]
        vecs = jnp.stack([
            pad_row(zD), pad_row(zF), pad_row(zD),
            pad_row(oD), pad_row(zD), pad_row(oD), pad_row(zD),
            jnp.zeros((vmax,), jnp.float32),
        ])
        params["layers"].append({
            "wqkvs": wqkvs, "bqkvs": bqkvs,
            "wo": nrm(ks[4], (d_model, d_model)),
            "w1": nrm(ks[5], (d_model, d_ff)),
            "w2": nrm(ks[6], (d_ff, d_model)),
            "vecs": vecs,
        })
    return params


def positional_embedding(L, d_model):
    pos = jnp.arange(L, dtype=jnp.float32)[:, None]
    i = jnp.arange(0, d_model, 2, dtype=jnp.float32)
    div = jnp.exp(i * (-math.log(10000.0) / d_model))
    pe = jnp.zeros((L, d_model), jnp.float32)
    pe = pe.at[:, 0::2].set(jnp.sin(pos * div))
    pe = pe.at[:, 1::2].set(jnp.cos(pos * div))
    return pe


# ----------------------------------------------------------------------------
# Forward pass: 1 embedding call + 2 calls per layer + 1 final call
# ----------------------------------------------------------------------------
def anomaly_transformer_forward(params, x, n_heads):
    B, L, _ = x.shape
    d_model = params["emb_w"].shape[-1]
    assert d_model % n_heads == 0

    pe = positional_embedding(L, d_model)
    enc = data_embedding(x, params["emb_w"], pe)   # dropout p=0.0 -> identity

    series_list, prior_list, sigma_list = [], [], []
    for lp in params["layers"]:
        attn_raw, series, prior, sigma_row = attention_layer(
            enc, lp["wqkvs"], lp["bqkvs"], n_heads)
        enc = encoder_layer(enc, attn_raw, lp["wo"], lp["w1"], lp["w2"], lp["vecs"])
        series_list.append(series)
        prior_list.append(prior)
        # match the PyTorch module's output contract: sigma repeated over keys
        sigma_list.append(jnp.broadcast_to(sigma_row, (B, n_heads, L, L)))

    out = final_norm_proj(enc, params["norm_g"], params["norm_b"],
                          params["proj_w"], params["proj_b"])
    # output_attention=True
    return out, series_list, prior_list, sigma_list


# ----------------------------------------------------------------------------
if __name__ == "__main__":
    # small config: win_size=16, enc_in=4, c_out=4, d_model=32, n_heads=4,
    #               d_ff=32, e_layers=2, dropout=0.0, activation='gelu'
    B, L, enc_in, c_out = 2, 16, 4, 4
    d_model, n_heads, d_ff, e_layers = 32, 4, 32, 2

    key = jax.random.PRNGKey(0)
    kx, kp = jax.random.split(key)
    x = jax.random.normal(kx, (B, L, enc_in), dtype=jnp.float32)
    params = init_params(kp, enc_in, d_model, n_heads, d_ff, c_out, e_layers)

    fwd = jax.jit(anomaly_transformer_forward, static_argnums=2)
    out, series, prior, sigmas = fwd(params, x, n_heads)

    jax.block_until_ready(out)
    for t in series + prior + sigmas:
        jax.block_until_ready(t)

    assert out.shape == (B, L, c_out)
    assert len(series) == e_layers and series[0].shape == (B, n_heads, L, L)
    assert prior[0].shape == (B, n_heads, L, L)
    assert sigmas[0].shape == (B, n_heads, L, L)
    print("KERNEL_OK")
</pallas_src>

<mosaic_0001>
module attributes {stable_mosaic.version = 11 : i64} {
  func.func @_embed_kernel(%arg0: i32, %arg1: memref<1x16x4xf32, #tpu.memory_space<vmem>>, %arg2: memref<1x16x4xf32, #tpu.memory_space<vmem>>, %arg3: memref<1x16x4xf32, #tpu.memory_space<vmem>>, %arg4: memref<3x4x32xf32, #tpu.memory_space<vmem>>, %arg5: memref<16x32xf32, #tpu.memory_space<vmem>>, %arg6: memref<1x16x32xf32, #tpu.memory_space<vmem>>) attributes {dimension_semantics = [#tpu.dimension_semantics<parallel>], iteration_bounds = array<i64: 2>, scalar_prefetch = 0 : i64, scratch_operands = 0 : i64, tpu.core_type = #tpu.core_type<tc>, window_params = [{transform_indices = @transform_0, window_bounds = array<i64: 1, 16, 4>}, {transform_indices = @transform_1, window_bounds = array<i64: 1, 16, 4>}, {transform_indices = @transform_2, window_bounds = array<i64: 1, 16, 4>}, {pipeline_mode = #tpu.pipeline_mode<synchronous>, transform_indices = @transform_3, window_bounds = array<i64: 3, 4, 32>}, {pipeline_mode = #tpu.pipeline_mode<synchronous>, transform_indices = @transform_4, window_bounds = array<i64: 16, 32>}, {transform_indices = @transform_5, window_bounds = array<i64: 1, 16, 32>}]} {
    %c0 = arith.constant 0 : index
    %c0_0 = arith.constant 0 : index
    %c0_1 = arith.constant 0 : index
    %0 = vector.load %arg1[%c0, %c0_0, %c0_1] : memref<1x16x4xf32, #tpu.memory_space<vmem>>, vector<1x16x4xf32>
    %1 = vector.shape_cast %0 : vector<1x16x4xf32> to vector<16x4xf32>
    %c0_2 = arith.constant 0 : index
    %c0_3 = arith.constant 0 : index
    %c0_4 = arith.constant 0 : index
    %2 = vector.load %arg4[%c0_2, %c0_3, %c0_4] : memref<3x4x32xf32, #tpu.memory_space<vmem>>, vector<1x4x32xf32>
    %3 = vector.shape_cast %2 : vector<1x4x32xf32> to vector<4x32xf32>
    %cst = arith.constant dense<0.000000e+00> : vector<16x32xf32>
    %4 = tpu.matmul %1, %3, %cst {dimension_numbers = #tpu.dot_dimension_numbers<[1], [0], [0], [1], [0, 0, 1, 1], [], []>} : vector<16x4xf32>, vector<4x32xf32>, vector<16x32xf32> -> vector<16x32xf32>
    %c0_5 = arith.constant 0 : index
    %c0_6 = arith.constant 0 : index
    %c0_7 = arith.constant 0 : index
    %5 = vector.load %arg2[%c0_5, %c0_6, %c0_7] : memref<1x16x4xf32, #tpu.memory_space<vmem>>, vector<1x16x4xf32>
    %6 = vector.shape_cast %5 : vector<1x16x4xf32> to vector<16x4xf32>
    %c1 = arith.constant 1 : index
    %c0_8 = arith.constant 0 : index
    %c0_9 = arith.constant 0 : index
    %7 = vector.load %arg4[%c1, %c0_8, %c0_9] : memref<3x4x32xf32, #tpu.memory_space<vmem>>, vector<1x4x32xf32>
    %8 = vector.shape_cast %7 : vector<1x4x32xf32> to vector<4x32xf32>
    %cst_10 = arith.constant dense<0.000000e+00> : vector<16x32xf32>
    %9 = tpu.matmul %6, %8, %cst_10 {dimension_numbers = #tpu.dot_dimension_numbers<[1], [0], [0], [1], [0, 0, 1, 1], [], []>} : vector<16x4xf32>, vector<4x32xf32>, vector<16x32xf32> -> vector<16x32xf32>
    %10 = arith.addf %4, %9 : vector<16x32xf32>
    %c0_11 = arith.constant 0 : index
    %c0_12 = arith.constant 0 : index
    %c0_13 = arith.constant 0 : index
    %11 = vector.load %arg3[%c0_11, %c0_12, %c0_13] : memref<1x16x4xf32, #tpu.memory_space<vmem>>, vector<1x16x4xf32>
    %12 = vector.shape_cast %11 : vector<1x16x4xf32> to vector<16x4xf32>
    %c2 = arith.constant 2 : index
    %c0_14 = arith.constant 0 : index
    %c0_15 = arith.constant 0 : index
    %13 = vector.load %arg4[%c2, %c0_14, %c0_15] : memref<3x4x32xf32, #tpu.memory_space<vmem>>, vector<1x4x32xf32>
    %14 = vector.shape_cast %13 : vector<1x4x32xf32> to vector<4x32xf32>
    %cst_16 = arith.constant dense<0.000000e+00> : vector<16x32xf32>
    %15 = tpu.matmul %12, %14, %cst_16 {dimension_numbers = #tpu.dot_dimension_numbers<[1], [0], [0], [1], [0, 0, 1, 1], [], []>} : vector<16x4xf32>, vector<4x32xf32>, vector<16x32xf32> -> vector<16x32xf32>
    %16 = arith.addf %10, %15 : vector<16x32xf32>
    %c0_17 = arith.constant 0 : index
    %c0_18 = arith.constant 0 : index
    %17 = vector.load %arg5[%c0_17, %c0_18] : memref<16x32xf32, #tpu.memory_space<vmem>>, vector<16x32xf32>
    %18 = arith.addf %16, %17 : vector<16x32xf32>
    %c0_19 = arith.constant 0 : index
    %c0_20 = arith.constant 0 : index
    %c0_21 = arith.constant 0 : index
    %19 = vector.load %arg6[%c0_19, %c0_20, %c0_21] : memref<1x16x32xf32, #tpu.memory_space<vmem>>, vector<1x16x32xf32>
    %20 = vector.shape_cast %19 : vector<1x16x32xf32> to vector<16x32xf32>
    %21 = vector.shape_cast %18 : vector<16x32xf32> to vector<1x16x32xf32>
    tpu.vector_store %arg6[%c0_19, %c0_20, %c0_21], %21 {strides = array<i32>} : memref<1x16x32xf32, #tpu.memory_space<vmem>>, vector<1x16x32xf32>,
    return
  }
  func.func @transform_0(%arg0: i32) -> (i32, i32, i32) {
    %c0_i32 = arith.constant 0 : i32
    %c0_i32_0 = arith.constant 0 : i32
    %c0_i32_1 = arith.constant 0 : i32
    return %arg0, %c0_i32, %c0_i32_0 : i32, i32, i32
  }
  func.func @transform_1(%arg0: i32) -> (i32, i32, i32) {
    %c0_i32 = arith.constant 0 : i32
    %c0_i32_0 = arith.constant 0 : i32
    %c0_i32_1 = arith.constant 0 : i32
    return %arg0, %c0_i32, %c0_i32_0 : i32, i32, i32
  }
  func.func @transform_2(%arg0: i32) -> (i32, i32, i32) {
    %c0_i32 = arith.constant 0 : i32
    %c0_i32_0 = arith.constant 0 : i32
    %c0_i32_1 = arith.constant 0 : i32
    return %arg0, %c0_i32, %c0_i32_0 : i32, i32, i32
  }
  func.func @transform_3(%arg0: i32) -> (i32, i32, i32) {
    %c0_i32 = arith.constant 0 : i32
    %c0_i32_0 = arith.constant 0 : i32
    %c0_i32_1 = arith.constant 0 : i32
    %c0_i32_2 = arith.constant 0 : i32
    return %c0_i32, %c0_i32_0, %c0_i32_1 : i32, i32, i32
  }
  func.func @transform_4(%arg0: i32) -> (i32, i32) {
    %c0_i32 = arith.constant 0 : i32
    %c0_i32_0 = arith.constant 0 : i32
    %c0_i32_1 = arith.constant 0 : i32
    return %c0_i32, %c0_i32_0 : i32, i32
  }
  func.func @transform_5(%arg0: i32) -> (i32, i32, i32) {
    %c0_i32 = arith.constant 0 : i32
    %c0_i32_0 = arith.constant 0 : i32
    %c0_i32_1 = arith.constant 0 : i32
    return %arg0, %c0_i32, %c0_i32_0 : i32, i32, i32
  }
}

module attributes {stable_mosaic.version = 11 : i64} {
  func.func @_attn_layer_kernel(%arg0: i32, %arg1: memref<1x16x32xf32, #tpu.memory_space<vmem>>, %arg2: memref<32x100xf32, #tpu.memory_space<vmem>>, %arg3: memref<1x100xf32, #tpu.memory_space<vmem>>, %arg4: memref<1x16x32xf32, #tpu.memory_space<vmem>>, %arg5: memref<1x4x16x16xf32, #tpu.memory_space<vmem>>, %arg6: memref<1x4x16x16xf32, #tpu.memory_space<vmem>>, %arg7: memref<1x4x16x1xf32, #tpu.memory_space<vmem>>) attributes {dimension_semantics = [#tpu.dimension_semantics<parallel>], iteration_bounds = array<i64: 2>, scalar_prefetch = 0 : i64, scratch_operands = 0 : i64, tpu.core_type = #tpu.core_type<tc>, window_params = [{transform_indices = @transform_0, window_bounds = array<i64: 1, 16, 32>}, {pipeline_mode = #tpu.pipeline_mode<synchronous>, transform_indices = @transform_1, window_bounds = array<i64: 32, 100>}, {pipeline_mode = #tpu.pipeline_mode<synchronous>, transform_indices = @transform_2, window_bounds = array<i64: 1, 100>}, {transform_indices = @transform_3, window_bounds = array<i64: 1, 16, 32>}, {transform_indices = @transform_4, window_bounds = array<i64: 1, 4, 16, 16>}, {transform_indices = @transform_5, window_bounds = array<i64: 1, 4, 16, 16>}, {transform_indices = @transform_6, window_bounds = array<i64: 1, 4, 16, 1>}]} {
    %c0 = arith.constant 0 : index
    %c0_0 = arith.constant 0 : index
    %c0_1 = arith.constant 0 : index
    %0 = vector.load %arg1[%c0, %c0_0, %c0_1] : memref<1x16x32xf32, #tpu.memory_space<vmem>>, vector<1x16x32xf32>
    %1 = vector.shape_cast %0 : vector<1x16x32xf32> to vector<16x32xf32>
    %c0_2 = arith.constant 0 : index
    %c0_3 = arith.constant 0 : index
    %2 = vector.load %arg2[%c0_2, %c0_3] : memref<32x100xf32, #tpu.memory_space<vmem>>, vector<32x100xf32>
    %cst = arith.constant dense<0.000000e+00> : vector<16x100xf32>
    %3 = tpu.matmul %1, %2, %cst {dimension_numbers = #tpu.dot_dimension_numbers<[1], [0], [0], [1], [0, 0, 1, 1], [], []>} : vector<16x32xf32>, vector<32x100xf32>, vector<16x100xf32> -> vector<16x100xf32>
    %c0_4 = arith.constant 0 : index
    %c0_5 = arith.constant 0 : index
    %4 = vector.load %arg3[%c0_4, %c0_5] : memref<1x100xf32, #tpu.memory_space<vmem>>, vector<1x100xf32>
    %5 = vector.broadcast %4 : vector<1x100xf32> to vector<16x100xf32>
    %6 = arith.addf %3, %5 : vector<16x100xf32>
    %7 = tpu.iota {dimensions = array<i32: 0>} : vector<16x16xi32>
    %8 = arith.sitofp %7 : vector<16x16xi32> to vector<16x16xf32>
    %9 = tpu.iota {dimensions = array<i32: 1>} : vector<16x16xi32>
    %10 = arith.sitofp %9 : vector<16x16xi32> to vector<16x16xf32>
    %11 = arith.subf %8, %10 : vector<16x16xf32>
    %12 = arith.mulf %11, %11 : vector<16x16xf32>
    %cst_6 = arith.constant -5.000000e-01 : f32
    %13 = vector.broadcast %cst_6 : f32 to vector<16x16xf32>
    %14 = arith.mulf %13, %12 : vector<16x16xf32>
    %15 = vector.extract_strided_slice %6 {offsets = [0, 96], sizes = [16, 4], strides = [1, 1]} : vector<16x100xf32> to vector<16x4xf32>
    %cst_7 = arith.constant 5.000000e+00 : f32
    %16 = vector.broadcast %cst_7 : f32 to vector<16x4xf32>
    %17 = arith.mulf %15, %16 : vector<16x4xf32>
    %18 = arith.negf %17 : vector<16x4xf32>
    %19 = math.exp %18 : vector<16x4xf32>
    %cst_8 = arith.constant 1.000000e+00 : f32
    %20 = vector.broadcast %cst_8 : f32 to vector<16x4xf32>
    %21 = arith.addf %20, %19 : vector<16x4xf32>
    %22 = arith.divf %20, %21 : vector<16x4xf32>
    %cst_9 = arith.constant 9.99999974E-6 : f32
    %23 = vector.broadcast %cst_9 : f32 to vector<16x4xf32>
    %24 = arith.addf %22, %23 : vector<16x4xf32>
    %cst_10 = arith.constant 1.09861231 : f32
    %25 = vector.broadcast %cst_10 : f32 to vector<16x4xf32>
    %26 = arith.mulf %24, %25 : vector<16x4xf32>
    %27 = math.exp %26 : vector<16x4xf32>
    %cst_11 = arith.constant 1.000000e+00 : f32
    %28 = vector.broadcast %cst_11 : f32 to vector<16x4xf32>
    %29 = arith.subf %27, %28 : vector<16x4xf32>
    %30 = tpu.reciprocal %29 {approx = true} : vector<16x4xf32> -> vector<16x4xf32>
    %31 = vector.extract_strided_slice %6 {offsets = [0, 0], sizes = [16, 8], strides = [1, 1]} : vector<16x100xf32> to vector<16x8xf32>
    %32 = vector.extract_strided_slice %6 {offsets = [0, 32], sizes = [16, 8], strides = [1, 1]} : vector<16x100xf32> to vector<16x8xf32>
    %33 = vector.extract_strided_slice %6 {offsets = [0, 64], sizes = [16, 8], strides = [1, 1]} : vector<16x100xf32> to vector<16x8xf32>
    %cst_12 = arith.constant dense<0.000000e+00> : vector<16x16xf32>
    %34 = tpu.matmul %31, %32, %cst_12 {dimension_numbers = #tpu.dot_dimension_numbers<[1], [1], [0], [0], [0, 0, 1, 0], [], []>} : vector<16x8xf32>, vector<16x8xf32>, vector<16x16xf32> -> vector<16x16xf32>
    %cst_13 = arith.constant 0.353553385 : f32
    %35 = vector.broadcast %cst_13 : f32 to vector<16x16xf32>
    %36 = arith.mulf %34, %35 : vector<16x16xf32>
    %cst_14 = arith.constant dense<0xFF800000> : vector<16xf32>
    %37 = vector.multi_reduction <maximumf>, %36, %cst_14 [1] : vector<16x16xf32> to vector<16xf32>
    %38 = vector.shape_cast %37 : vector<16xf32> to vector<16x1xf32>
    %39 = vector.broadcast %38 : vector<16x1xf32> to vector<16x16xf32>
    %40 = arith.subf %36, %39 : vector<16x16xf32>
    %41 = math.exp %40 : vector<16x16xf32>
    %cst_15 = arith.constant dense<0.000000e+00> : vector<16xf32>
    %42 = vector.multi_reduction <add>, %41, %cst_15 [1] : vector<16x16xf32> to vector<16xf32>
    %43 = vector.shape_cast %42 : vector<16xf32> to vector<16x1xf32>
    %44 = tpu.reciprocal %43 {approx = true} : vector<16x1xf32> -> vector<16x1xf32>
    %45 = vector.broadcast %44 : vector<16x1xf32> to vector<16x16xf32>
    %46 = arith.mulf %41, %45 : vector<16x16xf32>
    %47 = vector.extract_strided_slice %30 {offsets = [0, 0], sizes = [16, 1], strides = [1, 1]} : vector<16x4xf32> to vector<16x1xf32>
    %cst_16 = arith.constant 0.398942292 : f32
    %48 = vector.broadcast %cst_16 : f32 to vector<16x1xf32>
    %49 = arith.mulf %48, %47 : vector<16x1xf32>
    %50 = arith.mulf %47, %47 : vector<16x1xf32>
    %51 = vector.broadcast %50 : vector<16x1xf32> to vector<16x16xf32>
    %52 = arith.mulf %14, %51 : vector<16x16xf32>
    %53 = math.exp %52 : vector<16x16xf32>
    %54 = vector.broadcast %49 : vector<16x1xf32> to vector<16x16xf32>
    %55 = arith.mulf %54, %53 : vector<16x16xf32>
    %cst_17 = arith.constant dense<0.000000e+00> : vector<16x8xf32>
    %56 = tpu.matmul %46, %33, %cst_17 {dimension_numbers = #tpu.dot_dimension_numbers<[1], [0], [0], [1], [0, 0, 1, 1], [], []>} : vector<16x16xf32>, vector<16x8xf32>, vector<16x8xf32> -> vector<16x8xf32>
    %c0_18 = arith.constant 0 : index
    %c0_19 = arith.constant 0 : index
    %c0_20 = arith.constant 0 : index
    %57 = vector.load %arg4[%c0_18, %c0_19, %c0_20] : memref<1x16x32xf32, #tpu.memory_space<vmem>>, vector<1x16x8xf32>
    %58 = vector.shape_cast %57 : vector<1x16x8xf32> to vector<16x8xf32>
    %59 = vector.shape_cast %56 : vector<16x8xf32> to vector<1x16x8xf32>
    tpu.vector_store %arg4[%c0_18, %c0_19, %c0_20], %59 {strides = array<i32>} : memref<1x16x32xf32, #tpu.memory_space<vmem>>, vector<1x16x8xf32>,
    %c0_21 = arith.constant 0 : index
    %c0_22 = arith.constant 0 : index
    %c0_23 = arith.constant 0 : index
    %c0_24 = arith.constant 0 : index
    %60 = vector.load %arg5[%c0_21, %c0_22, %c0_23, %c0_24] : memref<1x4x16x16xf32, #tpu.memory_space<vmem>>, vector<1x1x16x16xf32>
    %61 = vector.shape_cast %60 : vector<1x1x16x16xf32> to vector<16x16xf32>
    %62 = vector.shape_cast %46 : vector<16x16xf32> to vector<1x1x16x16xf32>
    tpu.vector_store %arg5[%c0_21, %c0_22, %c0_23, %c0_24], %62 {strides = array<i32>} : memref<1x4x16x16xf32, #tpu.memory_space<vmem>>, vector<1x1x16x16xf32>,
    %c0_25 = arith.constant 0 : index
    %c0_26 = arith.constant 0 : index
    %c0_27 = arith.constant 0 : index
    %c0_28 = arith.constant 0 : index
    %63 = vector.load %arg6[%c0_25, %c0_26, %c0_27, %c0_28] : memref<1x4x16x16xf32, #tpu.memory_space<vmem>>, vector<1x1x16x16xf32>
    %64 = vector.shape_cast %63 : vector<1x1x16x16xf32> to vector<16x16xf32>
    %65 = vector.shape_cast %55 : vector<16x16xf32> to vector<1x1x16x16xf32>
    tpu.vector_store %arg6[%c0_25, %c0_26, %c0_27, %c0_28], %65 {strides = array<i32>} : memref<1x4x16x16xf32, #tpu.memory_space<vmem>>, vector<1x1x16x16xf32>,
    %66 = vector.extract_strided_slice %29 {offsets = [0, 0], sizes = [16, 1], strides = [1, 1]} : vector<16x4xf32> to vector<16x1xf32>
    %c0_29 = arith.constant 0 : index
    %c0_30 = arith.constant 0 : index
    %c0_31 = arith.constant 0 : index
    %c0_32 = arith.constant 0 : index
    %67 = vector.load %arg7[%c0_29, %c0_30, %c0_31, %c0_32] : memref<1x4x16x1xf32, #tpu.memory_space<vmem>>, vector<1x1x16x1xf32>
    %68 = vector.shape_cast %67 : vector<1x1x16x1xf32> to vector<16x1xf32>
    %69 = vector.shape_cast %66 : vector<16x1xf32> to vector<1x1x16x1xf32>
    tpu.vector_store %arg7[%c0_29, %c0_30, %c0_31, %c0_32], %69 {strides = array<i32>} : memref<1x4x16x1xf32, #tpu.memory_space<vmem>>, vector<1x1x16x1xf32>,
    %70 = vector.extract_strided_slice %6 {offsets = [0, 8], sizes = [16, 8], strides = [1, 1]} : vector<16x100xf32> to vector<16x8xf32>
    %71 = vector.extract_strided_slice %6 {offsets = [0, 40], sizes = [16, 8], strides = [1, 1]} : vector<16x100xf32> to vector<16x8xf32>
    %72 = vector.extract_strided_slice %6 {offsets = [0, 72], sizes = [16, 8], strides = [1, 1]} : vector<16x100xf32> to vector<16x8xf32>
    %cst_33 = arith.constant dense<0.000000e+00> : vector<16x16xf32>
    %73 = tpu.matmul %70, %71, %cst_33 {dimension_numbers = #tpu.dot_dimension_numbers<[1], [1], [0], [0], [0, 0, 1, 0], [], []>} : vector<16x8xf32>, vector<16x8xf32>, vector<16x16xf32> -> vector<16x16xf32>
    %cst_34 = arith.constant 0.353553385 : f32
    %74 = vector.broadcast %cst_34 : f32 to vector<16x16xf32>
    %75 = arith.mulf %73, %74 : vector<16x16xf32>
    %cst_35 = arith.constant dense<0xFF800000> : vector<16xf32>
    %76 = vector.multi_reduction <maximumf>, %75, %cst_35 [1] : vector<16x16xf32> to vector<16xf32>
    %77 = vector.shape_cast %76 : vector<16xf32> to vector<16x1xf32>
    %78 = vector.broadcast %77 : vector<16x1xf32> to vector<16x16xf32>
    %79 = arith.subf %75, %78 : vector<16x16xf32>
    %80 = math.exp %79 : vector<16x16xf32>
    %cst_36 = arith.constant dense<0.000000e+00> : vector<16xf32>
    %81 = vector.multi_reduction <add>, %80, %cst_36 [1] : vector<16x16xf32> to vector<16xf32>
    %82 = vector.shape_cast %81 : vector<16xf32> to vector<16x1xf32>
    %83 = tpu.reciprocal %82 {approx = true} : vector<16x1xf32> -> vector<16x1xf32>
    %84 = vector.broadcast %83 : vector<16x1xf32> to vector<16x16xf32>
    %85 = arith.mulf %80, %84 : vector<16x16xf32>
    %86 = vector.extract_strided_slice %30 {offsets = [0, 1], sizes = [16, 1], strides = [1, 1]} : vector<16x4xf32> to vector<16x1xf32>
    %cst_37 = arith.constant 0.398942292 : f32
    %87 = vector.broadcast %cst_37 : f32 to vector<16x1xf32>
    %88 = arith.mulf %87, %86 : vector<16x1xf32>
    %89 = arith.mulf %86, %86 : vector<16x1xf32>
    %90 = vector.broadcast %89 : vector<16x1xf32> to vector<16x16xf32>
    %91 = arith.mulf %14, %90 : vector<16x16xf32>
    %92 = math.exp %91 : vector<16x16xf32>
    %93 = vector.broadcast %88 : vector<16x1xf32> to vector<16x16xf32>
    %94 = arith.mulf %93, %92 : vector<16x16xf32>
    %cst_38 = arith.constant dense<0.000000e+00> : vector<16x8xf32>
    %95 = tpu.matmul %85, %72, %cst_38 {dimension_numbers = #tpu.dot_dimension_numbers<[1], [0], [0], [1], [0, 0, 1, 1], [], []>} : vector<16x16xf32>, vector<16x8xf32>, vector<16x8xf32> -> vector<16x8xf32>
    %c0_39 = arith.constant 0 : index
    %c0_40 = arith.constant 0 : index
    %c8 = arith.constant 8 : index
    %96 = vector.load %arg4[%c0_39, %c0_40, %c8] : memref<1x16x32xf32, #tpu.memory_space<vmem>>, vector<1x16x8xf32>
    %97 = vector.shape_cast %96 : vector<1x16x8xf32> to vector<16x8xf32>
    %98 = vector.shape_cast %95 : vector<16x8xf32> to vector<1x16x8xf32>
    tpu.vector_store %arg4[%c0_39, %c0_40, %c8], %98 {strides = array<i32>} : memref<1x16x32xf32, #tpu.memory_space<vmem>>, vector<1x16x8xf32>,
    %c0_41 = arith.constant 0 : index
    %c1 = arith.constant 1 : index
    %c0_42 = arith.constant 0 : index
    %c0_43 = arith.constant 0 : index
    %99 = vector.load %arg5[%c0_41, %c1, %c0_42, %c0_43] : memref<1x4x16x16xf32, #tpu.memory_space<vmem>>, vector<1x1x16x16xf32>
    %100 = vector.shape_cast %99 : vector<1x1x16x16xf32> to vector<16x16xf32>
    %101 = vector.shape_cast %85 : vector<16x16xf32> to vector<1x1x16x16xf32>
    tpu.vector_store %arg5[%c0_41, %c1, %c0_42, %c0_43], %101 {strides = array<i32>} : memref<1x4x16x16xf32, #tpu.memory_space<vmem>>, vector<1x1x16x16xf32>,
    %c0_44 = arith.constant 0 : index
    %c1_45 = arith.constant 1 : index
    %c0_46 = arith.constant 0 : index
    %c0_47 = arith.constant 0 : index
    %102 = vector.load %arg6[%c0_44, %c1_45, %c0_46, %c0_47] : memref<1x4x16x16xf32, #tpu.memory_space<vmem>>, vector<1x1x16x16xf32>
    %103 = vector.shape_cast %102 : vector<1x1x16x16xf32> to vector<16x16xf32>
    %104 = vector.shape_cast %94 : vector<16x16xf32> to vector<1x1x16x16xf32>
    tpu.vector_store %arg6[%c0_44, %c1_45, %c0_46, %c0_47], %104 {strides = array<i32>} : memref<1x4x16x16xf32, #tpu.memory_space<vmem>>, vector<1x1x16x16xf32>,
    %105 = vector.extract_strided_slice %29 {offsets = [0, 1], sizes = [16, 1], strides = [1, 1]} : vector<16x4xf32> to vector<16x1xf32>
    %c0_48 = arith.constant 0 : index
    %c1_49 = arith.constant 1 : index
    %c0_50 = arith.constant 0 : index
    %c0_51 = arith.constant 0 : index
    %106 = vector.load %arg7[%c0_48, %c1_49, %c0_50, %c0_51] : memref<1x4x16x1xf32, #tpu.memory_space<vmem>>, vector<1x1x16x1xf32>
    %107 = vector.shape_cast %106 : vector<1x1x16x1xf32> to vector<16x1xf32>
    %108 = vector.shape_cast %105 : vector<16x1xf32> to vector<1x1x16x1xf32>
    tpu.vector_store %arg7[%c0_48, %c1_49, %c0_50, %c0_51], %108 {strides = array<i32>} : memref<1x4x16x1xf32, #tpu.memory_space<vmem>>, vector<1x1x16x1xf32>,
    %109 = vector.extract_strided_slice %6 {offsets = [0, 16], sizes = [16, 8], strides = [1, 1]} : vector<16x100xf32> to vector<16x8xf32>
    %110 = vector.extract_strided_slice %6 {offsets = [0, 48], sizes = [16, 8], strides = [1, 1]} : vector<16x100xf32> to vector<16x8xf32>
    %111 = vector.extract_strided_slice %6 {offsets = [0, 80], sizes = [16, 8], strides = [1, 1]} : vector<16x100xf32> to vector<16x8xf32>
    %cst_52 = arith.constant dense<0.000000e+00> : vector<16x16xf32>
    %112 = tpu.matmul %109, %110, %cst_52 {dimension_numbers = #tpu.dot_dimension_numbers<[1], [1], [0], [0], [0, 0, 1, 0], [], []>} : vector<16x8xf32>, vector<16x8xf32>, vector<16x16xf32> -> vector<16x16xf32>
    %cst_53 = arith.constant 0.353553385 : f32
    %113 = vector.broadcast %cst_53 : f32 to vector<16x16xf32>
    %114 = arith.mulf %112, %113 : vector<16x16xf32>
    %cst_54 = arith.constant dense<0xFF800000> : vector<16xf32>
    %115 = vector.multi_reduction <maximumf>, %114, %cst_54 [1] : vector<16x16xf32> to vector<16xf32>
    %116 = vector.shape_cast %115 : vector<16xf32> to vector<16x1xf32>
    %117 = vector.broadcast %116 : vector<16x1xf32> to vector<16x16xf32>
    %118 = arith.subf %114, %117 : vector<16x16xf32>
    %119 = math.exp %118 : vector<16x16xf32>
    %cst_55 = arith.constant dense<0.000000e+00> : vector<16xf32>
    %120 = vector.multi_reduction <add>, %119, %cst_55 [1] : vector<16x16xf32> to vector<16xf32>
    %121 = vector.shape_cast %120 : vector<16xf32> to vector<16x1xf32>
    %122 = tpu.reciprocal %121 {approx = true} : vector<16x1xf32> -> vector<16x1xf32>
    %123 = vector.broadcast %122 : vector<16x1xf32> to vector<16x16xf32>
    %124 = arith.mulf %119, %123 : vector<16x16xf32>
    %125 = vector.extract_strided_slice %30 {offsets = [0, 2], sizes = [16, 1], strides = [1, 1]} : vector<16x4xf32> to vector<16x1xf32>
    %cst_56 = arith.constant 0.398942292 : f32
    %126 = vector.broadcast %cst_56 : f32 to vector<16x1xf32>
    %127 = arith.mulf %126, %125 : vector<16x1xf32>
    %128 = arith.mulf %125, %125 : vector<16x1xf32>
    %129 = vector.broadcast %128 : vector<16x1xf32> to vector<16x16xf32>
    %130 = arith.mulf %14, %129 : vector<16x16xf32>
    %131 = math.exp %130 : vector<16x16xf32>
    %132 = vector.broadcast %127 : vector<16x1xf32> to vector<16x16xf32>
    %133 = arith.mulf %132, %131 : vector<16x16xf32>
    %cst_57 = arith.constant dense<0.000000e+00> : vector<16x8xf32>
    %134 = tpu.matmul %124, %111, %cst_57 {dimension_numbers = #tpu.dot_dimension_numbers<[1], [0], [0], [1], [0, 0, 1, 1], [], []>} : vector<16x16xf32>, vector<16x8xf32>, vector<16x8xf32> -> vector<16x8xf32>
    %c0_58 = arith.constant 0 : index
    %c0_59 = arith.constant 0 : index
    %c16 = arith.constant 16 : index
    %135 = vector.load %arg4[%c0_58, %c0_59, %c16] : memref<1x16x32xf32, #tpu.memory_space<vmem>>, vector<1x16x8xf32>
    %136 = vector.shape_cast %135 : vector<1x16x8xf32> to vector<16x8xf32>
    %137 = vector.shape_cast %134 : vector<16x8xf32> to vector<1x16x8xf32>
    tpu.vector_store %arg4[%c0_58, %c0_59, %c16], %137 {strides = array<i32>} : memref<1x16x32xf32, #tpu.memory_space<vmem>>, vector<1x16x8xf32>,
    %c0_60 = arith.constant 0 : index
    %c2 = arith.constant 2 : index
    %c0_61 = arith.constant 0 : index
    %c0_62 = arith.constant 0 : index
    %138 = vector.load %arg5[%c0_60, %c2, %c0_61, %c0_62] : memref<1x4x16x16xf32, #tpu.memory_space<vmem>>, vector<1x1x16x16xf32>
    %139 = vector.shape_cast %138 : vector<1x1x16x16xf32> to vector<16x16xf32>
    %140 = vector.shape_cast %124 : vector<16x16xf32> to vector<1x1x16x16xf32>
    tpu.vector_store %arg5[%c0_60, %c2, %c0_61, %c0_62], %140 {strides = array<i32>} : memref<1x4x16x16xf32, #tpu.memory_space<vmem>>, vector<1x1x16x16xf32>,
    %c0_63 = arith.constant 0 : index
    %c2_64 = arith.constant 2 : index
    %c0_65 = arith.constant 0 : index
    %c0_66 = arith.constant 0 : index
    %141 = vector.load %arg6[%c0_63, %c2_64, %c0_65, %c0_66] : memref<1x4x16x16xf32, #tpu.memory_space<vmem>>, vector<1x1x16x16xf32>
    %142 = vector.shape_cast %141 : vector<1x1x16x16xf32> to vector<16x16xf32>
    %143 = vector.shape_cast %133 : vector<16x16xf32> to vector<1x1x16x16xf32>
    tpu.vector_store %arg6[%c0_63, %c2_64, %c0_65, %c0_66], %143 {strides = array<i32>} : memref<1x4x16x16xf32, #tpu.memory_space<vmem>>, vector<1x1x16x16xf32>,
    %144 = vector.extract_strided_slice %29 {offsets = [0, 2], sizes = [16, 1], strides = [1, 1]} : vector<16x4xf32> to vector<16x1xf32>
    %c0_67 = arith.constant 0 : index
    %c2_68 = arith.constant 2 : index
    %c0_69 = arith.constant 0 : index
    %c0_70 = arith.constant 0 : index
    %145 = vector.load %arg7[%c0_67, %c2_68, %c0_69, %c0_70] : memref<1x4x16x1xf32, #tpu.memory_space<vmem>>, vector<1x1x16x1xf32>
    %146 = vector.shape_cast %145 : vector<1x1x16x1xf32> to vector<16x1xf32>
    %147 = vector.shape_cast %144 : vector<16x1xf32> to vector<1x1x16x1xf32>
    tpu.vector_store %arg7[%c0_67, %c2_68, %c0_69, %c0_70], %147 {strides = array<i32>} : memref<1x4x16x1xf32, #tpu.memory_space<vmem>>, vector<1x1x16x1xf32>,
    %148 = vector.extract_strided_slice %6 {offsets = [0, 24], sizes = [16, 8], strides = [1, 1]} : vector<16x100xf32> to vector<16x8xf32>
    %149 = vector.extract_strided_slice %6 {offsets = [0, 56], sizes = [16, 8], strides = [1, 1]} : vector<16x100xf32> to vector<16x8xf32>
    %150 = vector.extract_strided_slice %6 {offsets = [0, 88], sizes = [16, 8], strides = [1, 1]} : vector<16x100xf32> to vector<16x8xf32>
    %cst_71 = arith.constant dense<0.000000e+00> : vector<16x16xf32>
    %151 = tpu.matmul %148, %149, %cst_71 {dimension_numbers = #tpu.dot_dimension_numbers<[1], [1], [0], [0], [0, 0, 1, 0], [], []>} : vector<16x8xf32>, vector<16x8xf32>, vector<16x16xf32> -> vector<16x16xf32>
    %cst_72 = arith.constant 0.353553385 : f32
    %152 = vector.broadcast %cst_72 : f32 to vector<16x16xf32>
    %153 = arith.mulf %151, %152 : vector<16x16xf32>
    %cst_73 = arith.constant dense<0xFF800000> : vector<16xf32>
    %154 = vector.multi_reduction <maximumf>, %153, %cst_73 [1] : vector<16x16xf32> to vector<16xf32>
    %155 = vector.shape_cast %154 : vector<16xf32> to vector<16x1xf32>
    %156 = vector.broadcast %155 : vector<16x1xf32> to vector<16x16xf32>
    %157 = arith.subf %153, %156 : vector<16x16xf32>
    %158 = math.exp %157 : vector<16x16xf32>
    %cst_74 = arith.constant dense<0.000000e+00> : vector<16xf32>
    %159 = vector.multi_reduction <add>, %158, %cst_74 [1] : vector<16x16xf32> to vector<16xf32>
    %160 = vector.shape_cast %159 : vector<16xf32> to vector<16x1xf32>
    %161 = tpu.reciprocal %160 {approx = true} : vector<16x1xf32> -> vector<16x1xf32>
    %162 = vector.broadcast %161 : vector<16x1xf32> to vector<16x16xf32>
    %163 = arith.mulf %158, %162 : vector<16x16xf32>
    %164 = vector.extract_strided_slice %30 {offsets = [0, 3], sizes = [16, 1], strides = [1, 1]} : vector<16x4xf32> to vector<16x1xf32>
    %cst_75 = arith.constant 0.398942292 : f32
    %165 = vector.broadcast %cst_75 : f32 to vector<16x1xf32>
    %166 = arith.mulf %165, %164 : vector<16x1xf32>
    %167 = arith.mulf %164, %164 : vector<16x1xf32>
    %168 = vector.broadcast %167 : vector<16x1xf32> to vector<16x16xf32>
    %169 = arith.mulf %14, %168 : vector<16x16xf32>
    %170 = math.exp %169 : vector<16x16xf32>
    %171 = vector.broadcast %166 : vector<16x1xf32> to vector<16x16xf32>
    %172 = arith.mulf %171, %170 : vector<16x16xf32>
    %cst_76 = arith.constant dense<0.000000e+00> : vector<16x8xf32>
    %173 = tpu.matmul %163, %150, %cst_76 {dimension_numbers = #tpu.dot_dimension_numbers<[1], [0], [0], [1], [0, 0, 1, 1], [], []>} : vector<16x16xf32>, vector<16x8xf32>, vector<16x8xf32> -> vector<16x8xf32>
    %c0_77 = arith.constant 0 : index
    %c0_78 = arith.constant 0 : index
    %c24 = arith.constant 24 : index
    %174 = vector.load %arg4[%c0_77, %c0_78, %c24] : memref<1x16x32xf32, #tpu.memory_space<vmem>>, vector<1x16x8xf32>
    %175 = vector.shape_cast %174 : vector<1x16x8xf32> to vector<16x8xf32>
    %176 = vector.shape_cast %173 : vector<16x8xf32> to vector<1x16x8xf32>
    tpu.vector_store %arg4[%c0_77, %c0_78, %c24], %176 {strides = array<i32>} : memref<1x16x32xf32, #tpu.memory_space<vmem>>, vector<1x16x8xf32>,
    %c0_79 = arith.constant 0 : index
    %c3 = arith.constant 3 : index
    %c0_80 = arith.constant 0 : index
    %c0_81 = arith.constant 0 : index
    %177 = vector.load %arg5[%c0_79, %c3, %c0_80, %c0_81] : memref<1x4x16x16xf32, #tpu.memory_space<vmem>>, vector<1x1x16x16xf32>
    %178 = vector.shape_cast %177 : vector<1x1x16x16xf32> to vector<16x16xf32>
    %179 = vector.shape_cast %163 : vector<16x16xf32> to vector<1x1x16x16xf32>
    tpu.vector_store %arg5[%c0_79, %c3, %c0_80, %c0_81], %179 {strides = array<i32>} : memref<1x4x16x16xf32, #tpu.memory_space<vmem>>, vector<1x1x16x16xf32>,
    %c0_82 = arith.constant 0 : index
    %c3_83 = arith.constant 3 : index
    %c0_84 = arith.constant 0 : index
    %c0_85 = arith.constant 0 : index
    %180 = vector.load %arg6[%c0_82, %c3_83, %c0_84, %c0_85] : memref<1x4x16x16xf32, #tpu.memory_space<vmem>>, vector<1x1x16x16xf32>
    %181 = vector.shape_cast %180 : vector<1x1x16x16xf32> to vector<16x16xf32>
    %182 = vector.shape_cast %172 : vector<16x16xf32> to vector<1x1x16x16xf32>
    tpu.vector_store %arg6[%c0_82, %c3_83, %c0_84, %c0_85], %182 {strides = array<i32>} : memref<1x4x16x16xf32, #tpu.memory_space<vmem>>, vector<1x1x16x16xf32>,
    %183 = vector.extract_strided_slice %29 {offsets = [0, 3], sizes = [16, 1], strides = [1, 1]} : vector<16x4xf32> to vector<16x1xf32>
    %c0_86 = arith.constant 0 : index
    %c3_87 = arith.constant 3 : index
    %c0_88 = arith.constant 0 : index
    %c0_89 = arith.constant 0 : index
    %184 = vector.load %arg7[%c0_86, %c3_87, %c0_88, %c0_89] : memref<1x4x16x1xf32, #tpu.memory_space<vmem>>, vector<1x1x16x1xf32>
    %185 = vector.shape_cast %184 : vector<1x1x16x1xf32> to vector<16x1xf32>
    %186 = vector.shape_cast %183 : vector<16x1xf32> to vector<1x1x16x1xf32>
    tpu.vector_store %arg7[%c0_86, %c3_87, %c0_88, %c0_89], %186 {strides = array<i32>} : memref<1x4x16x1xf32, #tpu.memory_space<vmem>>, vector<1x1x16x1xf32>,
    return
  }
  func.func @transform_0(%arg0: i32) -> (i32, i32, i32) {
    %c0_i32 = arith.constant 0 : i32
    %c0_i32_0 = arith.constant 0 : i32
    %c0_i32_1 = arith.constant 0 : i32
    return %arg0, %c0_i32, %c0_i32_0 : i32, i32, i32
  }
  func.func @transform_1(%arg0: i32) -> (i32, i32) {
    %c0_i32 = arith.constant 0 : i32
    %c0_i32_0 = arith.constant 0 : i32
    %c0_i32_1 = arith.constant 0 : i32
    return %c0_i32, %c0_i32_0 : i32, i32
  }
  func.func @transform_2(%arg0: i32) -> (i32, i32) {
    %c0_i32 = arith.constant 0 : i32
    %c0_i32_0 = arith.constant 0 : i32
    %c0_i32_1 = arith.constant 0 : i32
    return %c0_i32, %c0_i32_0 : i32, i32
  }
  func.func @transform_3(%arg0: i32) -> (i32, i32, i32) {
    %c0_i32 = arith.constant 0 : i32
    %c0_i32_0 = arith.constant 0 : i32
    %c0_i32_1 = arith.constant 0 : i32
    return %arg0, %c0_i32, %c0_i32_0 : i32, i32, i32
  }
  func.func @transform_4(%arg0: i32) -> (i32, i32, i32, i32) {
    %c0_i32 = arith.constant 0 : i32
    %c0_i32_0 = arith.constant 0 : i32
    %c0_i32_1 = arith.constant 0 : i32
    %c0_i32_2 = arith.constant 0 : i32
    return %arg0, %c0_i32, %c0_i32_0, %c0_i32_1 : i32, i32, i32, i32
  }
  func.func @transform_5(%arg0: i32) -> (i32, i32, i32, i32) {
    %c0_i32 = arith.constant 0 : i32
    %c0_i32_0 = arith.constant 0 : i32
    %c0_i32_1 = arith.constant 0 : i32
    %c0_i32_2 = arith.constant 0 : i32
    return %arg0, %c0_i32, %c0_i32_0, %c0_i32_1 : i32, i32, i32, i32
  }
  func.func @transform_6(%arg0: i32) -> (i32, i32, i32, i32) {
    %c0_i32 = arith.constant 0 : i32
    %c0_i32_0 = arith.constant 0 : i32
    %c0_i32_1 = arith.constant 0 : i32
    %c0_i32_2 = arith.constant 0 : i32
    return %arg0, %c0_i32, %c0_i32_0, %c0_i32_1 : i32, i32, i32, i32
  }
}

module attributes {stable_mosaic.version = 11 : i64} {
  func.func @_encoder_layer_kernel(%arg0: i32, %arg1: memref<1x16x32xf32, #tpu.memory_space<vmem>>, %arg2: memref<1x16x32xf32, #tpu.memory_space<vmem>>, %arg3: memref<32x32xf32, #tpu.memory_space<vmem>>, %arg4: memref<32x32xf32, #tpu.memory_space<vmem>>, %arg5: memref<32x32xf32, #tpu.memory_space<vmem>>, %arg6: memref<8x32xf32, #tpu.memory_space<vmem>>, %arg7: memref<1x16x32xf32, #tpu.memory_space<vmem>>) attributes {dimension_semantics = [#tpu.dimension_semantics<parallel>], iteration_bounds = array<i64: 2>, scalar_prefetch = 0 : i64, scratch_operands = 0 : i64, tpu.core_type = #tpu.core_type<tc>, window_params = [{transform_indices = @transform_0, window_bounds = array<i64: 1, 16, 32>}, {transform_indices = @transform_1, window_bounds = array<i64: 1, 16, 32>}, {pipeline_mode = #tpu.pipeline_mode<synchronous>, transform_indices = @transform_2, window_bounds = array<i64: 32, 32>}, {pipeline_mode = #tpu.pipeline_mode<synchronous>, transform_indices = @transform_3, window_bounds = array<i64: 32, 32>}, {pipeline_mode = #tpu.pipeline_mode<synchronous>, transform_indices = @transform_4, window_bounds = array<i64: 32, 32>}, {pipeline_mode = #tpu.pipeline_mode<synchronous>, transform_indices = @transform_5, window_bounds = array<i64: 8, 32>}, {transform_indices = @transform_6, window_bounds = array<i64: 1, 16, 32>}]} {
    %c0 = arith.constant 0 : index
    %c0_0 = arith.constant 0 : index
    %c0_1 = arith.constant 0 : index
    %0 = vector.load %arg1[%c0, %c0_0, %c0_1] : memref<1x16x32xf32, #tpu.memory_space<vmem>>, vector<1x16x32xf32>
    %1 = vector.shape_cast %0 : vector<1x16x32xf32> to vector<16x32xf32>
    %c0_2 = arith.constant 0 : index
    %c0_3 = arith.constant 0 : index
    %c0_4 = arith.constant 0 : index
    %2 = vector.load %arg2[%c0_2, %c0_3, %c0_4] : memref<1x16x32xf32, #tpu.memory_space<vmem>>, vector<1x16x32xf32>
    %3 = vector.shape_cast %2 : vector<1x16x32xf32> to vector<16x32xf32>
    %c0_5 = arith.constant 0 : index
    %c0_6 = arith.constant 0 : index
    %4 = vector.load %arg6[%c0_5, %c0_6] : memref<8x32xf32, #tpu.memory_space<vmem>>, vector<1x32xf32>
    %c1 = arith.constant 1 : index
    %c0_7 = arith.constant 0 : index
    %5 = vector.load %arg6[%c1, %c0_7] : memref<8x32xf32, #tpu.memory_space<vmem>>, vector<1x32xf32>
    %c2 = arith.constant 2 : index
    %c0_8 = arith.constant 0 : index
    %6 = vector.load %arg6[%c2, %c0_8] : memref<8x32xf32, #tpu.memory_space<vmem>>, vector<1x32xf32>
    %c3 = arith.constant 3 : index
    %c0_9 = arith.constant 0 : index
    %7 = vector.load %arg6[%c3, %c0_9] : memref<8x32xf32, #tpu.memory_space<vmem>>, vector<1x32xf32>
    %c4 = arith.constant 4 : index
    %c0_10 = arith.constant 0 : index
    %8 = vector.load %arg6[%c4, %c0_10] : memref<8x32xf32, #tpu.memory_space<vmem>>, vector<1x32xf32>
    %c5 = arith.constant 5 : index
    %c0_11 = arith.constant 0 : index
    %9 = vector.load %arg6[%c5, %c0_11] : memref<8x32xf32, #tpu.memory_space<vmem>>, vector<1x32xf32>
    %c6 = arith.constant 6 : index
    %c0_12 = arith.constant 0 : index
    %10 = vector.load %arg6[%c6, %c0_12] : memref<8x32xf32, #tpu.memory_space<vmem>>, vector<1x32xf32>
    %c0_13 = arith.constant 0 : index
    %c0_14 = arith.constant 0 : index
    %11 = vector.load %arg3[%c0_13, %c0_14] : memref<32x32xf32, #tpu.memory_space<vmem>>, vector<32x32xf32>
    %cst = arith.constant dense<0.000000e+00> : vector<16x32xf32>
    %12 = tpu.matmul %3, %11, %cst {dimension_numbers = #tpu.dot_dimension_numbers<[1], [0], [0], [1], [0, 0, 1, 1], [], []>} : vector<16x32xf32>, vector<32x32xf32>, vector<16x32xf32> -> vector<16x32xf32>
    %13 = vector.broadcast %4 : vector<1x32xf32> to vector<16x32xf32>
    %14 = arith.addf %12, %13 : vector<16x32xf32>
    %15 = arith.addf %1, %14 : vector<16x32xf32>
    %cst_15 = arith.constant dense<0.000000e+00> : vector<16xf32>
    %16 = vector.multi_reduction <add>, %15, %cst_15 [1] : vector<16x32xf32> to vector<16xf32>
    %17 = vector.shape_cast %16 : vector<16xf32> to vector<16x1xf32>
    %cst_16 = arith.constant 3.200000e+01 : f32
    %18 = vector.broadcast %cst_16 : f32 to vector<16x1xf32>
    %19 = arith.divf %17, %18 : vector<16x1xf32>
    %20 = vector.broadcast %19 : vector<16x1xf32> to vector<16x32xf32>
    %21 = arith.subf %15, %20 : vector<16x32xf32>
    %22 = arith.mulf %21, %21 : vector<16x32xf32>
    %cst_17 = arith.constant dense<0.000000e+00> : vector<16xf32>
    %23 = vector.multi_reduction <add>, %22, %cst_17 [1] : vector<16x32xf32> to vector<16xf32>
    %24 = vector.shape_cast %23 : vector<16xf32> to vector<16x1xf32>
    %cst_18 = arith.constant 3.200000e+01 : f32
    %25 = vector.broadcast %cst_18 : f32 to vector<16x1xf32>
    %26 = arith.divf %24, %25 : vector<16x1xf32>
    %27 = vector.broadcast %19 : vector<16x1xf32> to vector<16x32xf32>
    %28 = arith.subf %15, %27 : vector<16x32xf32>
    %cst_19 = arith.constant 9.99999974E-6 : f32
    %29 = vector.broadcast %cst_19 : f32 to vector<16x1xf32>
    %30 = arith.addf %26, %29 : vector<16x1xf32>
    %31 = math.rsqrt %30 : vector<16x1xf32>
    %32 = vector.broadcast %31 : vector<16x1xf32> to vector<16x32xf32>
    %33 = arith.mulf %28, %32 : vector<16x32xf32>
    %34 = vector.broadcast %7 : vector<1x32xf32> to vector<16x32xf32>
    %35 = arith.mulf %33, %34 : vector<16x32xf32>
    %36 = vector.broadcast %8 : vector<1x32xf32> to vector<16x32xf32>
    %37 = arith.addf %35, %36 : vector<16x32xf32>
    %c0_20 = arith.constant 0 : index
    %c0_21 = arith.constant 0 : index
    %38 = vector.load %arg4[%c0_20, %c0_21] : memref<32x32xf32, #tpu.memory_space<vmem>>, vector<32x32xf32>
    %cst_22 = arith.constant dense<0.000000e+00> : vector<16x32xf32>
    %39 = tpu.matmul %37, %38, %cst_22 {dimension_numbers = #tpu.dot_dimension_numbers<[1], [0], [0], [1], [0, 0, 1, 1], [], []>} : vector<16x32xf32>, vector<32x32xf32>, vector<16x32xf32> -> vector<16x32xf32>
    %40 = vector.broadcast %5 : vector<1x32xf32> to vector<16x32xf32>
    %41 = arith.addf %39, %40 : vector<16x32xf32>
    %cst_23 = arith.constant 5.000000e-01 : f32
    %42 = vector.broadcast %cst_23 : f32 to vector<16x32xf32>
    %43 = arith.mulf %42, %41 : vector<16x32xf32>
    %cst_24 = arith.constant 0.707106769 : f32
    %44 = vector.broadcast %cst_24 : f32 to vector<16x32xf32>
    %45 = arith.mulf %41, %44 : vector<16x32xf32>
    %46 = math.erf %45 : vector<16x32xf32>
    %cst_25 = arith.constant 1.000000e+00 : f32
    %47 = vector.broadcast %cst_25 : f32 to vector<16x32xf32>
    %48 = arith.addf %47, %46 : vector<16x32xf32>
    %49 = arith.mulf %43, %48 : vector<16x32xf32>
    %c0_26 = arith.constant 0 : index
    %c0_27 = arith.constant 0 : index
    %50 = vector.load %arg5[%c0_26, %c0_27] : memref<32x32xf32, #tpu.memory_space<vmem>>, vector<32x32xf32>
    %cst_28 = arith.constant dense<0.000000e+00> : vector<16x32xf32>
    %51 = tpu.matmul %49, %50, %cst_28 {dimension_numbers = #tpu.dot_dimension_numbers<[1], [0], [0], [1], [0, 0, 1, 1], [], []>} : vector<16x32xf32>, vector<32x32xf32>, vector<16x32xf32> -> vector<16x32xf32>
    %52 = vector.broadcast %6 : vector<1x32xf32> to vector<16x32xf32>
    %53 = arith.addf %51, %52 : vector<16x32xf32>
    %54 = arith.addf %37, %53 : vector<16x32xf32>
    %cst_29 = arith.constant dense<0.000000e+00> : vector<16xf32>
    %55 = vector.multi_reduction <add>, %54, %cst_29 [1] : vector<16x32xf32> to vector<16xf32>
    %56 = vector.shape_cast %55 : vector<16xf32> to vector<16x1xf32>
    %cst_30 = arith.constant 3.200000e+01 : f32
    %57 = vector.broadcast %cst_30 : f32 to vector<16x1xf32>
    %58 = arith.divf %56, %57 : vector<16x1xf32>
    %59 = vector.broadcast %58 : vector<16x1xf32> to vector<16x32xf32>
    %60 = arith.subf %54, %59 : vector<16x32xf32>
    %61 = arith.mulf %60, %60 : vector<16x32xf32>
    %cst_31 = arith.constant dense<0.000000e+00> : vector<16xf32>
    %62 = vector.multi_reduction <add>, %61, %cst_31 [1] : vector<16x32xf32> to vector<16xf32>
    %63 = vector.shape_cast %62 : vector<16xf32> to vector<16x1xf32>
    %cst_32 = arith.constant 3.200000e+01 : f32
    %64 = vector.broadcast %cst_32 : f32 to vector<16x1xf32>
    %65 = arith.divf %63, %64 : vector<16x1xf32>
    %66 = vector.broadcast %58 : vector<16x1xf32> to vector<16x32xf32>
    %67 = arith.subf %54, %66 : vector<16x32xf32>
    %cst_33 = arith.constant 9.99999974E-6 : f32
    %68 = vector.broadcast %cst_33 : f32 to vector<16x1xf32>
    %69 = arith.addf %65, %68 : vector<16x1xf32>
    %70 = math.rsqrt %69 : vector<16x1xf32>
    %71 = vector.broadcast %70 : vector<16x1xf32> to vector<16x32xf32>
    %72 = arith.mulf %67, %71 : vector<16x32xf32>
    %73 = vector.broadcast %9 : vector<1x32xf32> to vector<16x32xf32>
    %74 = arith.mulf %72, %73 : vector<16x32xf32>
    %75 = vector.broadcast %10 : vector<1x32xf32> to vector<16x32xf32>
    %76 = arith.addf %74, %75 : vector<16x32xf32>
    %c0_34 = arith.constant 0 : index
    %c0_35 = arith.constant 0 : index
    %c0_36 = arith.constant 0 : index
    %77 = vector.load %arg7[%c0_34, %c0_35, %c0_36] : memref<1x16x32xf32, #tpu.memory_space<vmem>>, vector<1x16x32xf32>
    %78 = vector.shape_cast %77 : vector<1x16x32xf32> to vector<16x32xf32>
    %79 = vector.shape_cast %76 : vector<16x32xf32> to vector<1x16x32xf32>
    tpu.vector_store %arg7[%c0_34, %c0_35, %c0_36], %79 {strides = array<i32>} : memref<1x16x32xf32, #tpu.memory_space<vmem>>, vector<1x16x32xf32>,
    return
  }
  func.func @transform_0(%arg0: i32) -> (i32, i32, i32) {
    %c0_i32 = arith.constant 0 : i32
    %c0_i32_0 = arith.constant 0 : i32
    %c0_i32_1 = arith.constant 0 : i32
    return %arg0, %c0_i32, %c0_i32_0 : i32, i32, i32
  }
  func.func @transform_1(%arg0: i32) -> (i32, i32, i32) {
    %c0_i32 = arith.constant 0 : i32
    %c0_i32_0 = arith.constant 0 : i32
    %c0_i32_1 = arith.constant 0 : i32
    return %arg0, %c0_i32, %c0_i32_0 : i32, i32, i32
  }
  func.func @transform_2(%arg0: i32) -> (i32, i32) {
    %c0_i32 = arith.constant 0 : i32
    %c0_i32_0 = arith.constant 0 : i32
    %c0_i32_1 = arith.constant 0 : i32
    return %c0_i32, %c0_i32_0 : i32, i32
  }
  func.func @transform_3(%arg0: i32) -> (i32, i32) {
    %c0_i32 = arith.constant 0 : i32
    %c0_i32_0 = arith.constant 0 : i32
    %c0_i32_1 = arith.constant 0 : i32
    return %c0_i32, %c0_i32_0 : i32, i32
  }
  func.func @transform_4(%arg0: i32) -> (i32, i32) {
    %c0_i32 = arith.constant 0 : i32
    %c0_i32_0 = arith.constant 0 : i32
    %c0_i32_1 = arith.constant 0 : i32
    return %c0_i32, %c0_i32_0 : i32, i32
  }
  func.func @transform_5(%arg0: i32) -> (i32, i32) {
    %c0_i32 = arith.constant 0 : i32
    %c0_i32_0 = arith.constant 0 : i32
    %c0_i32_1 = arith.constant 0 : i32
    return %c0_i32, %c0_i32_0 : i32, i32
  }
  func.func @transform_6(%arg0: i32) -> (i32, i32, i32) {
    %c0_i32 = arith.constant 0 : i32
    %c0_i32_0 = arith.constant 0 : i32
    %c0_i32_1 = arith.constant 0 : i32
    return %arg0, %c0_i32, %c0_i32_0 : i32, i32, i32
  }
}

module attributes {stable_mosaic.version = 11 : i64} {
  func.func @_final_norm_proj_kernel(%arg0: i32, %arg1: memref<1x16x32xf32, #tpu.memory_space<vmem>>, %arg2: memref<1x32xf32, #tpu.memory_space<vmem>>, %arg3: memref<1x32xf32, #tpu.memory_space<vmem>>, %arg4: memref<32x4xf32, #tpu.memory_space<vmem>>, %arg5: memref<1x4xf32, #tpu.memory_space<vmem>>, %arg6: memref<1x16x4xf32, #tpu.memory_space<vmem>>) attributes {dimension_semantics = [#tpu.dimension_semantics<parallel>], iteration_bounds = array<i64: 2>, scalar_prefetch = 0 : i64, scratch_operands = 0 : i64, tpu.core_type = #tpu.core_type<tc>, window_params = [{transform_indices = @transform_0, window_bounds = array<i64: 1, 16, 32>}, {pipeline_mode = #tpu.pipeline_mode<synchronous>, transform_indices = @transform_1, window_bounds = array<i64: 1, 32>}, {pipeline_mode = #tpu.pipeline_mode<synchronous>, transform_indices = @transform_2, window_bounds = array<i64: 1, 32>}, {pipeline_mode = #tpu.pipeline_mode<synchronous>, transform_indices = @transform_3, window_bounds = array<i64: 32, 4>}, {pipeline_mode = #tpu.pipeline_mode<synchronous>, transform_indices = @transform_4, window_bounds = array<i64: 1, 4>}, {transform_indices = @transform_5, window_bounds = array<i64: 1, 16, 4>}]} {
    %c0 = arith.constant 0 : index
    %c0_0 = arith.constant 0 : index
    %c0_1 = arith.constant 0 : index
    %0 = vector.load %arg1[%c0, %c0_0, %c0_1] : memref<1x16x32xf32, #tpu.memory_space<vmem>>, vector<1x16x32xf32>
    %1 = vector.shape_cast %0 : vector<1x16x32xf32> to vector<16x32xf32>
    %c0_2 = arith.constant 0 : index
    %c0_3 = arith.constant 0 : index
    %2 = vector.load %arg2[%c0_2, %c0_3] : memref<1x32xf32, #tpu.memory_space<vmem>>, vector<1x32xf32>
    %c0_4 = arith.constant 0 : index
    %c0_5 = arith.constant 0 : index
    %3 = vector.load %arg3[%c0_4, %c0_5] : memref<1x32xf32, #tpu.memory_space<vmem>>, vector<1x32xf32>
    %cst = arith.constant dense<0.000000e+00> : vector<16xf32>
    %4 = vector.multi_reduction <add>, %1, %cst [1] : vector<16x32xf32> to vector<16xf32>
    %5 = vector.shape_cast %4 : vector<16xf32> to vector<16x1xf32>
    %cst_6 = arith.constant 3.200000e+01 : f32
    %6 = vector.broadcast %cst_6 : f32 to vector<16x1xf32>
    %7 = arith.divf %5, %6 : vector<16x1xf32>
    %8 = vector.broadcast %7 : vector<16x1xf32> to vector<16x32xf32>
    %9 = arith.subf %1, %8 : vector<16x32xf32>
    %10 = arith.mulf %9, %9 : vector<16x32xf32>
    %cst_7 = arith.constant dense<0.000000e+00> : vector<16xf32>
    %11 = vector.multi_reduction <add>, %10, %cst_7 [1] : vector<16x32xf32> to vector<16xf32>
    %12 = vector.shape_cast %11 : vector<16xf32> to vector<16x1xf32>
    %cst_8 = arith.constant 3.200000e+01 : f32
    %13 = vector.broadcast %cst_8 : f32 to vector<16x1xf32>
    %14 = arith.divf %12, %13 : vector<16x1xf32>
    %15 = vector.broadcast %7 : vector<16x1xf32> to vector<16x32xf32>
    %16 = arith.subf %1, %15 : vector<16x32xf32>
    %cst_9 = arith.constant 9.99999974E-6 : f32
    %17 = vector.broadcast %cst_9 : f32 to vector<16x1xf32>
    %18 = arith.addf %14, %17 : vector<16x1xf32>
    %19 = math.rsqrt %18 : vector<16x1xf32>
    %20 = vector.broadcast %19 : vector<16x1xf32> to vector<16x32xf32>
    %21 = arith.mulf %16, %20 : vector<16x32xf32>
    %22 = vector.broadcast %2 : vector<1x32xf32> to vector<16x32xf32>
    %23 = arith.mulf %21, %22 : vector<16x32xf32>
    %24 = vector.broadcast %3 : vector<1x32xf32> to vector<16x32xf32>
    %25 = arith.addf %23, %24 : vector<16x32xf32>
    %c0_10 = arith.constant 0 : index
    %c0_11 = arith.constant 0 : index
    %26 = vector.load %arg4[%c0_10, %c0_11] : memref<32x4xf32, #tpu.memory_space<vmem>>, vector<32x4xf32>
    %cst_12 = arith.constant dense<0.000000e+00> : vector<16x4xf32>
    %27 = tpu.matmul %25, %26, %cst_12 {dimension_numbers = #tpu.dot_dimension_numbers<[1], [0], [0], [1], [0, 0, 1, 1], [], []>} : vector<16x32xf32>, vector<32x4xf32>, vector<16x4xf32> -> vector<16x4xf32>
    %c0_13 = arith.constant 0 : index
    %c0_14 = arith.constant 0 : index
    %28 = vector.load %arg5[%c0_13, %c0_14] : memref<1x4xf32, #tpu.memory_space<vmem>>, vector<1x4xf32>
    %29 = vector.broadcast %28 : vector<1x4xf32> to vector<16x4xf32>
    %30 = arith.addf %27, %29 : vector<16x4xf32>
    %c0_15 = arith.constant 0 : index
    %c0_16 = arith.constant 0 : index
    %c0_17 = arith.constant 0 : index
    %31 = vector.load %arg6[%c0_15, %c0_16, %c0_17] : memref<1x16x4xf32, #tpu.memory_space<vmem>>, vector<1x16x4xf32>
    %32 = vector.shape_cast %31 : vector<1x16x4xf32> to vector<16x4xf32>
    %33 = vector.shape_cast %30 : vector<16x4xf32> to vector<1x16x4xf32>
    tpu.vector_store %arg6[%c0_15, %c0_16, %c0_17], %33 {strides = array<i32>} : memref<1x16x4xf32, #tpu.memory_space<vmem>>, vector<1x16x4xf32>,
    return
  }
  func.func @transform_0(%arg0: i32) -> (i32, i32, i32) {
    %c0_i32 = arith.constant 0 : i32
    %c0_i32_0 = arith.constant 0 : i32
    %c0_i32_1 = arith.constant 0 : i32
    return %arg0, %c0_i32, %c0_i32_0 : i32, i32, i32
  }
  func.func @transform_1(%arg0: i32) -> (i32, i32) {
    %c0_i32 = arith.constant 0 : i32
    %c0_i32_0 = arith.constant 0 : i32
    %c0_i32_1 = arith.constant 0 : i32
    return %c0_i32, %c0_i32_0 : i32, i32
  }
  func.func @transform_2(%arg0: i32) -> (i32, i32) {
    %c0_i32 = arith.constant 0 : i32
    %c0_i32_0 = arith.constant 0 : i32
    %c0_i32_1 = arith.constant 0 : i32
    return %c0_i32, %c0_i32_0 : i32, i32
  }
  func.func @transform_3(%arg0: i32) -> (i32, i32) {
    %c0_i32 = arith.constant 0 : i32
    %c0_i32_0 = arith.constant 0 : i32
    %c0_i32_1 = arith.constant 0 : i32
    return %c0_i32, %c0_i32_0 : i32, i32
  }
  func.func @transform_4(%arg0: i32) -> (i32, i32) {
    %c0_i32 = arith.constant 0 : i32
    %c0_i32_0 = arith.constant 0 : i32
    %c0_i32_1 = arith.constant 0 : i32
    return %c0_i32, %c0_i32_0 : i32, i32
  }
  func.func @transform_5(%arg0: i32) -> (i32, i32, i32) {
    %c0_i32 = arith.constant 0 : i32
    %c0_i32_0 = arith.constant 0 : i32
    %c0_i32_1 = arith.constant 0 : i32
    return %arg0, %c0_i32, %c0_i32_0 : i32, i32, i32
  }
}

</mosaic_0001>

<bundles_post_ra>
// kernel: anomaly_transformer_forward.6
= control target key start
LH: loop header
LB: loop body
LE: loop exit
PB: predicated region body
PF: predicated region fallthrough
CT: control target
= control target key end

     0   :  { %s718_s18 = smov 0   ;;  %s768_s0 = inlined_call_operand.vmem [shape: f32[2,16,4], index: 0, kind: input, shape index: {}]   ;;  %s769_s1 = inlined_call_operand.vmem [shape: f32[2,16,4], index: 1, kind: input, shape index: {}]   ;;  %s770_s2 = inlined_call_operand.vmem [shape: f32[2,16,4], index: 2, kind: input, shape index: {}]   ;;  %s771_s3 = inlined_call_operand.vmem [shape: f32[3,4,32], index: 3, kind: input, shape index: {}]   ;;  %s772_s4 = inlined_call_operand.vmem [shape: f32[16,32], index: 4, kind: input, shape index: {}]   ;;  %s773_s5 = inlined_call_operand.vmem [shape: f32[2,16,32], index: 5, kind: output, shape index: {}]  }
   0x1 LB: > { %s618_s19 = sadd.s32 4294967295, %s686_s18   ;;  %p622_p0 = scmp.ge.s32.totalorder %s686_s18, 1  ;;  %s686_s18 = sphi %s718_s18, %s15_s18  }
   0x2   : > { %p207_p1 = scmp.lt.s32.totalorder %s686_s18, 3 }
   0x4   : > { %p208_p2 = pnand %p622_p0, %p207_p1 }
   0x5   : > { %p245_p3 = scmp.lt.s32.totalorder (!%p208_p2), %s618_s19, 1 }
   0x6   : > { %211 = sbr.rel (%p208_p2) target bundleno = 220 (0xdc), region = 40 }
   0xb   : > { %v631_v0 = vld [vmem:[%s771_s3 + $0x4] sm:$0xf]  ;;  %vm279_vm0 = vcmask 1043456   ;;  %v267_v1 = vld [vmem:[%s771_s3] sm:$0xf]  ;;  %s775_s19 = smov (!%p245_p3, %s618_s19), 1 }
   0xc   : > { %657 = vmatprep.subr.msk.mxu0 %vm279_vm0, %v631_v0  ;;  %662 = vmatprep.subr.msk.mxu1 %vm279_vm0, %v267_v1  ;;  %v638_v2 = vld [vmem:[%s771_s3 + $0x8] sm:$0xf]  ;;  %s644_s26 = sshll.u32 %s775_s19, 4  ;;  %vm272_vm1 = vcmask 31744   ;;  %vm536_vm2 = vcmask 261120   ;;  %v532_v19 = vld [vmem:[%s772_s4] sm:$0xff] }
   0xd   : > { %658 = vmatpush3.msk.msra.mxu0 %vm279_vm0, %v631_v0  ;;  %663 = vmatpush3.msk.msra.mxu1 %vm279_vm0, %v267_v1  ;;  %s254_s29 = scalar_lea.vmem %s769_s1, %s644_s26  ;;  %s249_s7 = scalar_lea.vmem %s768_s0, %s644_s26  ;;  %v533_v15 = vld [vmem:[%s772_s4 + $0x8] sm:$0xff] }
   0xe   : > { %667 = vmatprep.subr.msk.mxu0 %vm279_vm0, %v638_v2  ;;  %v268_v3 = vld [vmem:[%s254_s29] sm:$0xff]  ;;  %v269_v4 = vld [vmem:[%s254_s29 + $0x8] sm:$0xff]  ;;  %s259_s10 = scalar_lea.vmem %s770_s2, %s644_s26  ;;  %s264_s15 = scalar_lea.vmem %s773_s5, %s644_s26 }
   0xf   : > { %v265_v5 = vld [vmem:[%s249_s7] sm:$0xff]  ;;  %659 = vmatprep.mubr.msk.f32.mxu0 %vm272_vm1, %v268_v3  ;;  %v266_v6 = vld [vmem:[%s249_s7 + $0x8] sm:$0xff] }
  0x10   : > { %664 = vmatprep.mubr.msk.f32.mxu1 %vm272_vm1, %v265_v5  ;;  %v442_v7 = vld [vmem:[%s259_s10] sm:$0xff]  ;;  %660 = vmatmul.mubr.msk.f32.vlgmr.msra.gmra.mxu0 %vm272_vm1, %v269_v4  ;;  %v443_v8 = vld [vmem:[%s259_s10 + $0x8] sm:$0xff] }
  0x11   : > { %665 = vmatmul.mubr.msk.f32.vlgmr.msra.gmra.mxu1 %vm272_vm1, %v266_v6  ;;  %668 = vmatpush3.msk.msra.mxu0 %vm279_vm0, %v638_v2 }
  0x12   : > { %669 = vmatprep.mubr.msk.f32.mxu0 %vm272_vm1, %v442_v7 }
  0x14   : > { %670 = vmatmul.mubr.msk.f32.vlgmr.msra.gmra.mxu0 %vm272_vm1, %v443_v8 }
  0xd0   : > { %v661_v9 = vpop.f32.mrf.mxu0 }
  0xd1   : > { %v666_v10 = vpop.f32.mrf.mxu1 }
  0xd2   : > { %v349_v11 = vpop.f32.mrf.mxu0  ;;  %v439_v13 = vadd.f32 %v666_v10, %v661_v9 }
  0xd3   : > { %v433_v12 = vpop.f32.mrf.mxu1 }
  0xd4   : > { %v671_v14 = vpop.f32.mrf.mxu0  ;;  %v434_v16 = vadd.f32 %v433_v12, %v349_v11 }
  0xd5   : > { %v531_v17 = vadd.f32 %v671_v14, %v439_v13 }
  0xd6   : > { %v521_v18 = vpop.f32.mrf.mxu0 }
  0xd7   : > { %v535_v20 = vadd.f32 %v533_v15, %v531_v17  ;;  %v530_v21 = vadd.f32 %v521_v18, %v434_v16 }
  0xd9   : > { %538 = vst.msk [vmem:[%s264_s15 + $0x8] sm:$0xff] %vm536_vm2, %v535_v20  ;;  %v534_v22 = vadd.f32 %v532_v19, %v530_v21 }
  0xdb   : > { %537 = vst.msk [vmem:[%s264_s15] sm:$0xff] %vm536_vm2, %v534_v22 }
  0xdc PF: > { %s15_s18 = sadd.s32 1, %s686_s18  }
  0xdd   : > { %p12_p4 = scmp.ge.s32.totalorder %s15_s18, 4  }
  0xdf   :  { %14 = sbr.rel (!%p12_p4) target bundleno = 1 (0x1), region = 78 }

// kernel: anomaly_transformer_forward.7
= control target key start
LH: loop header
LB: loop body
LE: loop exit
PB: predicated region body
PF: predicated region fallthrough
CT: control target
= control target key end

     0   :  { %12 = vsyncpa [#allocation3], 0  ;;  %s2508_s0 = inlined_call_operand.vmem [shape: f32[2,16,32], index: 0, kind: input, shape index: {}]   ;;  %s2509_s1 = inlined_call_operand.vmem [shape: f32[32,100], index: 1, kind: input, shape index: {}]   ;;  %s2510_s2 = inlined_call_operand.vmem [shape: f32[1,100], index: 2, kind: input, shape index: {}]   ;;  %s2511_s3 = inlined_call_operand.vmem [shape: f32[2,16,32], index: 3, kind: output, shape index: {0}]   ;;  %s2512_s4 = inlined_call_operand.hbm [shape: f32[2,4,16,16], index: 4, kind: output, shape index: {1}]   ;;  %s2513_s5 = inlined_call_operand.hbm [shape: f32[2,4,16,16], index: 5, kind: output, shape index: {2}]   ;;  %s2514_s6 = inlined_call_operand.vmem [shape: f32[2,4,16,1], index: 6, kind: output, shape index: {3}]  }
   0x1   :  { %14 = vsyncpa [#allocation3 + $0x1], 0 }
   0x2   :  { %15 = vsyncpa [#allocation5], 0 }
   0x3   :  { %17 = vsyncpa [#allocation5 + $0x1], 0  ;;  %s2092_s21 = smov 0   ;;  %s2094_s22 = smov 0  }
   0x4   :  { %s2096_s23 = smov 0   ;;  %s2098_s24 = smov 0  }
   0x5 LB: > { %s2113_s25 = sadd.s32 4294967295, %s2030_s24   ;;  %s1622_s26 = sadd.s32 4294967294, %s2030_s24   ;;  %s2030_s24 = sphi %s2098_s24, %s2524_s24   ;;  %s2026_s23 = sphi %s2096_s23, %s2523_s23   ;;  %s2022_s22 = sphi %s2094_s22, %s2522_s22   ;;  %s2018_s21 = sphi %s2092_s21, %s2521_s21  }
   0x6   : > { %s2117_s27 = sadd.s32 1, %s2030_s24   ;;  %s124_s28 = sadd.s32 1, %s2026_s23 }
   0x7   : > { %s121_s29 = ssub.s32 %s2030_s24, %s2117_s27  ;;  %p134_p0 = scmp.ne.s32.totalorder %s2026_s23, %s2022_s22 }
   0x8   : > { %p122_p1 = scmp.eq.s32.totalorder %s121_s29, 0  ;;  %p135_p2 = scmp.eq.s32.totalorder %s2113_s25, 1 }
   0x9   : > { %p140_p3 = scmp.ne.s32.totalorder %s2022_s22, %s2018_s21  ;;  %p141_p4 = scmp.eq.s32.totalorder %s1622_s26, 1 }
   0xa   : > { %s2128_s30 = scalar_select %p122_p1, %s2026_s23, %s124_s28  }
   0xb   : > { %p2130_p5 = por %p135_p2, %p134_p0  ;;  %p2134_p6 = por %p141_p4, %p140_p3 }
   0xc   : > { %p1625_p7 = scmp.ge.s32.totalorder %s2030_s24, 1  ;;  %p225_p8 = scmp.lt.s32.totalorder %s2030_s24, 3 }
   0xe   : > { %p226_p9 = pnand %p1625_p7, %p225_p8 }
   0xf   : > { %p270_p10 = scmp.lt.s32.totalorder (!%p226_p9), %s2113_s25, 1  ;;  %s2032_s9 = smov (!%p226_p9), 88  }
  0x10   : > { %229 = sbr.rel (%p226_p9) target bundleno = 2266 (0x8da), region = 32  ;;  %s2033_s10 = smov (!%p226_p9), 96  }
  0x11   : > { %s2034_s11 = smov (!%p226_p9), 120   ;;  %s2035_s12 = smov (!%p226_p9), 64  }
  0x12   : > { %s2036_s13 = smov (!%p226_p9), 56   ;;  %s2037_s14 = smov (!%p226_p9), 80  }
  0x13   : > { %s2038_s16 = smov (!%p226_p9), 112   ;;  %s2206_s17 = sand.u32 (!%p226_p9), 1, %s2022_s22  }
  0x14   : > { %s1626_s19 = sshll.u32 (!%p226_p9), %s2206_s17, 6 }
  0x15   : > { %v290_v0 = vld [vmem:[%s2509_s1 + $0x18] sm:$0xff]  ;;  %v289_v1 = vld [vmem:[%s2509_s1 + $0x10] sm:$0xff]  ;;  %v288_v2 = vld [vmem:[%s2509_s1 + $0x8] sm:$0xff]  ;;  %s2151_s15 = scalar_select %p270_p10, %s2113_s25, 1  ;;  %vm298_vm0 = vcmask 261120   ;;  %vm426_vm1 = vcmask 64512  }
  0x16   : > { %1734 = vmatprep.subr.mxu0 %v290_v0  ;;  %v287_v3 = vld [vmem:[%s2509_s1] sm:$0xff]  ;;  %vm512_vm2 = vcmask 130048   ;;  %s2211_s20 = scalar_lea.vmem [#allocation2], %s1626_s19  ;;  %vm668_vm3 = vcmask 7168   ;;  %vm905_vm4 = vcmask 130112   ;;  %vm1157_vm5 = vcmask 195712  }
  0x17   : > { %1735 = vmatpush3.msra.mxu0 %v290_v0  ;;  %s1691_s18 = sshll.u32 %s2151_s15, 4  ;;  %v1634_v6 = vld [vmem:[%s2510_s2] ss:$0 sm:$0xff]  ;;  %s1693_s28 = sshll.u32 %s2151_s15, 6 }
  0x18   : > { %1736 = vmatprep.subr.mxu0 %v289_v1  ;;  %s274_s26 = scalar_lea.vmem %s2508_s0, %s1691_s18  ;;  %s2236_s29 = scalar_lea.vmem %s2511_s3, %s1691_s18 }
  0x19   : > { %1737 = vmatpush3.msra.mxu0 %v289_v1  ;;  %v285_v4 = vld [vmem:[%s274_s26] sm:$0xff]  ;;  %v286_v5 = vld [vmem:[%s274_s26 + $0x8] sm:$0xff]  ;;  %s2039_s18 = smov 48   ;;  %s2051_s26 = smov 30  }
  0x1a   : > { %1738 = vmatprep.subr.mxu0 %v288_v2  ;;  %1742 = vmatprep.mubr.msk.f32.mxu0 %vm298_vm0, %v285_v4  ;;  %s2341_s15 = scalar_lea.vmem [#allocation4], %s1626_s19  ;;  %s1694_s19 = sshll.u32 %s2113_s25, 10 }
  0x1b   : > { %1739 = vmatpush3.msra.mxu0 %v288_v2  ;;  %s2052_s25 = smov [#allocation2]  }
  0x1c   : > { %1740 = vmatprep.subr.mxu0 %v287_v3 }
  0x1d   : > { %1741 = vmatpush3.msra.mxu0 %v287_v3 }
  0x1e   : > { %1743 = vmatmul.mubr.msk.f32.vlgmr.msra.gmra.mxu0 %vm298_vm0, %v286_v5 }
  0xde   : > { %v1744_v7 = vpop.f32.mrf.mxu0 }
  0xdf   : > { %v2165_v8 = vadd.f32 %v1744_v7, %v1634_v6 }
  0xe0   : > { %v371_v9 = vpop.f32.mrf.mxu0 }
  0xe1   : > { %v2167_v10 = vadd.f32 %v1634_v6, %v371_v9  ;;  %677 = vrot.lane.b32.xlu1 %v2165_v8, %s2032_s9  ;;  %424 = vrot.lane.b32.xlu0 %v2165_v8, %s2033_s10 }
  0xe3   : > { %1749 = vmatprep.mubr.msk.f32.mxu1 %vm426_vm1, %v2167_v10 }
  0xe5   : > { %675 = vrot.lane.b32.xlu1 %v2167_v10, %s2032_s9  ;;  %422 = vrot.lane.b32.xlu0 %v2167_v10, %s2033_s10  ;;  %s2040_s9 = smov 72   ;;  %s2041_s10 = smov 104  }
  0xe9   : > { %673 = vrot.lane.b32.xlu1 %v2165_v8, %s2034_s11  ;;  %671 = vrot.lane.b32.xlu0 %v2167_v10, %s2034_s11  ;;  %s2043_s11 = smov 40  }
 0x153   : > { %v425_v11 = vpop.permute.xlu0 %424  ;;  %v678_v12 = vpop.permute.xlu1 %677 }
 0x154   : > { %1745 = vmatprep.subr.msk.mxu1 %vm426_vm1, %v425_v11 }
 0x155   : > { %1746 = vmatpush3.xpose.msk.msra.mxu1 %vm426_vm1, %v425_v11 }
 0x157   : > { %v423_v13 = vpop.permute.xlu0 %422  ;;  %v676_v15 = vpop.permute.xlu1 %675 }
 0x158   : > { %1747 = vmatprep.subr.msk.mxu1 %vm426_vm1, %v423_v13 }
 0x159   : > { %1748 = vmatpush3.xpose.msk.msra.mxu1 %vm426_vm1, %v423_v13 }
 0x15a   : > { %1759 = vmatprep.subr.msk.mxu1 %vm426_vm1, %v678_v12 }
 0x15b   : > { %v672_v14 = vpop.permute.xlu0 %671  ;;  %v674_v16 = vpop.permute.xlu1 %673 }
 0x15c   : > { %1750 = vmatmul.mubr.msk.f32.vlgmr.msra.gmra.mxu1 %vm426_vm1, %v2165_v8 }
 0x15d   : > { %1760 = vmatpush3.xpose.msk.msra.mxu1 %vm426_vm1, %v678_v12  ;;  %1763 = vmatprep.mubr.msk.f32.mxu1 %vm426_vm1, %v672_v14 }
 0x15e   : > { %1761 = vmatprep.subr.msk.mxu1 %vm426_vm1, %v676_v15 }
 0x161   : > { %1762 = vmatpush3.xpose.msk.msra.mxu1 %vm426_vm1, %v676_v15 }
 0x164   : > { %1764 = vmatmul.mubr.msk.f32.vlgmr.msra.gmra.mxu1 %vm426_vm1, %v674_v16 }
 0x21c   : > { %v1751_v17 = vpop.f32.mrf.mxu1 }
 0x21d   : > { %v511_v18 = vmul.f32 0.35355338, %v1751_v17 }
 0x21e   : > { %v501_v19 = vpop.f32.mrf.mxu1 }
 0x21f   : > { %v510_v20 = vmul.f32 0.35355338, %v501_v19  ;;  %v516_v21 = vsel %vm512_vm2, %v511_v18, -inf }
 0x220   : > { %517 = vmax.xlane.f32.xlu1 %v516_v21 }
 0x221   : > { %v513_v22 = vsel %vm512_vm2, %v510_v20, -inf }
 0x222   : > { %514 = vmax.xlane.f32.xlu0 %v513_v22 }
 0x224   : > { %v1765_v23 = vpop.f32.mrf.mxu1 }
 0x225   : > { %v763_v26 = vmul.f32 0.35355338, %v1765_v23 }
 0x226   : > { %v753_v24 = vpop.f32.mrf.mxu1 }
 0x227   : > { %v762_v25 = vmul.f32 0.35355338, %v753_v24  ;;  %v767_v28 = vsel %vm512_vm2, %v763_v26, -inf }
 0x229   : > { %v764_v27 = vsel %vm512_vm2, %v762_v25, -inf }
 0x22a   : > { %765 = vmax.xlane.f32.xlu0 %v764_v27 }
 0x22e   : > { %768 = vmax.xlane.f32.xlu0 %v767_v28 }
 0x231   : > { %569 = vrot.lane.b32.xlu1 %v2165_v8, %s2035_s12 }
 0x235   : > { %812 = vrot.lane.b32.xlu1 %v2165_v8, %s2036_s13 }
 0x239   : > { %810 = vrot.lane.b32.xlu1 %v2167_v10, %s2036_s13  ;;  %s2515_s13 = smov 8  }
 0x244   : > { %567 = vrot.lane.b32.xlu0 %v2167_v10, %s2035_s12  ;;  %s2044_s12 = smov 32  }
 0x2a9   : > { %v518_v29 = vpop.xlane.xlu1 %517 }
 0x2aa   : > { %v520_v30 = vsub.f32 %v511_v18, %v518_v29 }
 0x2ab   : > { %v515_v31 = vpop.xlane.xlu0 %514 }
 0x2ac   : > { %v523_v32 = vmul.f32 1.442695, %v520_v30  ;;  %v519_v33 = vsub.f32 %v510_v20, %v515_v31 }
 0x2ad   : > { %v570_v34 = vpop.permute.xlu1 %569 }
 0x2ae   : > { %1876 = vpow2.f32 %v523_v32  ;;  %v521_v35 = vmul.f32 1.442695, %v519_v33  ;;  %1752 = vmatprep.subr.mxu0 %v570_v34 }
 0x2af   : > { %1753 = vmatpush3.msra.mxu0 %v570_v34 }
 0x2b0   : > { %1878 = vpow2.f32 %v521_v35 }
 0x2b1   : > { %v813_v44 = vpop.permute.xlu1 %812 }
 0x2b3   : > { %v766_v36 = vpop.xlane.xlu0 %765 }
 0x2b4   : > { %v770_v48 = vsub.f32 %v762_v25, %v766_v36 }
 0x2b5   : > { %v811_v52 = vpop.permute.xlu1 %810 }
 0x2b6   : > { %v772_v49 = vmul.f32 1.442695, %v770_v48 }
 0x2b7   : > { %v769_v37 = vpop.xlane.xlu0 %768 }
 0x2b8   : > { %v771_v38 = vsub.f32 %v763_v26, %v769_v37 }
 0x2ba   : > { %v774_v39 = vmul.f32 1.442695, %v771_v38 }
 0x2bb   : > { %v1877_v40 = vpop.eup %1876  ;;  %v568_v41 = vpop.permute.xlu0 %567 }
 0x2bc   : > { %1880 = vpow2.f32 %v774_v39  ;;  %1754 = vmatprep.subr.mxu0 %v568_v41  ;;  %v528_v42 = vsel %vm512_vm2, %v1877_v40, 0.0  ;;  %v2042_v39 = vmov 96  }
 0x2bd   : > { %v1879_v43 = vpop.eup %1878  ;;  %529 = vadd.xlane.f32.xlu0 %v528_v42  ;;  %1755 = vmatpush3.msra.mxu0 %v568_v41  ;;  %1882 = vpow2.f32 %v772_v49  ;;  %v1638_v42 = vmul.f32 -5.0, %v2165_v8 }
 0x2be   : > { %1766 = vmatprep.subr.mxu0 %v813_v44  ;;  %v525_v45 = vsel %vm512_vm2, %v1879_v43, 0.0  ;;  %1868 = vset.pattern.permute.xlu1 %v2042_v39 }
 0x2bf   : > { %526 = vadd.xlane.f32.xlu1 %v525_v45  ;;  %1869 = vset.pattern.permute.xlu0 %v2042_v39 }
 0x2c9   : > { %v1881_v46 = vpop.eup %1880 }
 0x2ca   : > { %v779_v47 = vsel %vm512_vm2, %v1881_v46, 0.0  ;;  %v1883_v50 = vpop.eup %1882 }
 0x2cb   : > { %780 = vadd.xlane.f32.xlu0 %v779_v47  ;;  %v776_v51 = vsel %vm512_vm2, %v1883_v50, 0.0 }
 0x2d0   : > { %927 = vrot.lane.b32.xlu1 %v2167_v10, %s2037_s14 }
 0x2e1   : > { %929 = vrot.lane.b32.xlu0 %v2165_v8, %s2037_s14  ;;  %s2048_s14 = smov 31  }
 0x2e5   : > { %923 = vrot.lane.b32.xlu0 %v2167_v10, %s2038_s16 }
 0x2f4   : > { %777 = vadd.xlane.f32.xlu1 %v776_v51 }
 0x305   : > { %925 = vrot.lane.b32.xlu1 %v2165_v8, %s2038_s16  ;;  %s2049_s16 = smov 16  }
 0x346   : > { %v530_v53 = vpop.xlane.xlu0 %529 }
 0x347   : > { %1884 = vrcp.f32 %v530_v53 }
 0x348   : > { %v527_v54 = vpop.xlane.xlu1 %526 }
 0x349   : > { %1886 = vrcp.f32 %v527_v54 }
 0x34c   : > { %v928_v63 = vpop.permute.xlu1 %927 }
 0x354   : > { %v1885_v55 = vpop.eup %1884  ;;  %v781_v56 = vpop.xlane.xlu0 %780 }
 0x355   : > { %1888 = vrcp.f32 %v781_v56  ;;  %v534_v57 = vmul.f32 %v1885_v55, %v1877_v40  ;;  %v1637_v40 = vmul.f32 -5.0, %v2167_v10 }
 0x356   : > { %v1887_v58 = vpop.eup %1886 }
 0x357   : > { %v533_v59 = vmul.f32 %v1887_v58, %v1879_v43  ;;  %657 = vst.msk [vmem:[%s2211_s20 + $0x8] sm:$0xff] %vm512_vm2, %v534_v57  ;;  %v398_v41 = vmul.f32 1.442695, %v1637_v40  ;;  %v400_v43 = vmul.f32 1.442695, %v1638_v42 }
 0x358   : > { %v930_v60 = vpop.permute.xlu0 %929 }
 0x359   : > { %1756 = vmatprep.mubr.msk.f32.mxu0 %vm512_vm2, %v533_v59  ;;  %656 = vst.msk [vmem:[%s2211_s20] sm:$0xff] %vm512_vm2, %v533_v59 }
 0x35a   : > { %1757 = vmatmul.mubr.msk.f32.vlgmr.msra.gmra.mxu0 %vm512_vm2, %v534_v57 }
 0x35b   : > { %1767 = vmatpush3.msra.mxu0 %v813_v44 }
 0x35c   : > { %1768 = vmatprep.subr.mxu0 %v811_v52  ;;  %v924_v3 = vpop.permute.xlu0 %923 }
 0x35d   : > { %1769 = vmatpush3.msra.mxu0 %v811_v52 }
 0x35e   : > { %1773 = vmatprep.subr.msk.mxu0 %vm426_vm1, %v930_v60 }
 0x362   : > { %v1889_v61 = vpop.eup %1888 }
 0x363   : > { %v785_v62 = vmul.f32 %v1889_v61, %v1881_v46 }
 0x365   : > { %1654 = vst.msk [vmem:[%s2211_s20 + $0x18] sm:$0xff] %vm512_vm2, %v785_v62 }
 0x37d   : > { %v778_v0 = vpop.xlane.xlu1 %777 }
 0x37e   : > { %1890 = vrcp.f32 %v778_v0 }
 0x381   : > { %v926_v4 = vpop.permute.xlu1 %925 }
 0x38b   : > { %v1891_v1 = vpop.eup %1890 }
 0x38c   : > { %v784_v2 = vmul.f32 %v1891_v1, %v1883_v50 }
 0x38e   : > { %1770 = vmatprep.mubr.msk.f32.mxu0 %vm512_vm2, %v784_v2  ;;  %1653 = vst.msk [vmem:[%s2211_s20 + $0x10] sm:$0xff] %vm512_vm2, %v784_v2 }
 0x38f   : > { %1771 = vmatmul.mubr.msk.f32.vlgmr.msra.gmra.mxu0 %vm512_vm2, %v785_v62 }
 0x390   : > { %1774 = vmatpush3.xpose.msk.msra.mxu0 %vm426_vm1, %v930_v60  ;;  %1777 = vmatprep.mubr.msk.f32.mxu0 %vm426_vm1, %v924_v3 }
 0x391   : > { %1775 = vmatprep.subr.msk.mxu0 %vm426_vm1, %v928_v63 }
 0x394   : > { %1776 = vmatpush3.xpose.msk.msra.mxu0 %vm426_vm1, %v928_v63 }
 0x397   : > { %1778 = vmatmul.mubr.msk.f32.vlgmr.msra.gmra.mxu0 %vm426_vm1, %v926_v4 }
 0x41a   : > { %v1758_v5 = vpop.f32.mrf.mxu0 }
 0x41b   : > { %655 = vst.msk [vmem:[%s2236_s29 + $0x8] sm:$0xff] %vm426_vm1, %v1758_v5 }
 0x41c   : > { %v645_v6 = vpop.f32.mrf.mxu0 }
 0x41d   : > { %654 = vst.msk [vmem:[%s2236_s29] sm:$0xff] %vm426_vm1, %v645_v6 }
 0x44f   : > { %v2242_v7 = vpop.f32.mrf.mxu0 }
 0x451   : > { %v2244_v9 = vpop.f32.mrf.mxu0 }
 0x457   : > { %v1779_v11 = vpop.f32.mrf.mxu0 }
 0x458   : > { %v1015_v12 = vmul.f32 0.35355338, %v1779_v11 }
 0x459   : > { %v1005_v13 = vpop.f32.mrf.mxu0 }
 0x45a   : > { %v1014_v14 = vmul.f32 0.35355338, %v1005_v13  ;;  %v1019_v15 = vsel %vm512_vm2, %v1015_v12, -inf  ;;  %v2045_v13 = vmov 97  }
 0x45b   : > { %1020 = vmax.xlane.f32.xlu1 %v1019_v15  ;;  %v2050_v15 = vmov 99  }
 0x45c   : > { %v1016_v16 = vsel %vm512_vm2, %v1014_v14, -inf }
 0x45d   : > { %1017 = vmax.xlane.f32.xlu0 %v1016_v16 }
 0x46c   : > { %1064 = vrot.lane.b32.xlu1 %v2165_v8, %s2039_s18 }
 0x470   : > { %1181 = vrot.lane.b32.xlu1 %v2165_v8, %s2040_s9 }
 0x474   : > { %1179 = vrot.lane.b32.xlu1 %v2167_v10, %s2040_s9 }
 0x478   : > { %1177 = vrot.lane.b32.xlu1 %v2165_v8, %s2041_s10 }
 0x4e4   : > { %v1021_v17 = vpop.xlane.xlu1 %1020 }
 0x4e5   : > { %v1023_v18 = vsub.f32 %v1015_v12, %v1021_v17 }
 0x4e6   : > { %v1018_v19 = vpop.xlane.xlu0 %1017 }
 0x4e7   : > { %v1026_v20 = vmul.f32 1.442695, %v1023_v18  ;;  %v1022_v21 = vsub.f32 %v1014_v14, %v1018_v19  ;;  %v2047_v14 = vmov 98  }
 0x4e8   : > { %v1065_v22 = vpop.permute.xlu1 %1064 }
 0x4e9   : > { %1892 = vpow2.f32 %v1026_v20  ;;  %v1024_v23 = vmul.f32 1.442695, %v1022_v21  ;;  %1780 = vmatprep.subr.mxu1 %v1065_v22 }
 0x4ea   : > { %1781 = vmatpush3.msra.mxu1 %v1065_v22 }
 0x4eb   : > { %1894 = vpow2.f32 %v1024_v23 }
 0x4ec   : > { %v1182_v31 = vpop.permute.xlu1 %1181 }
 0x4f0   : > { %v1180_v37 = vpop.permute.xlu1 %1179 }
 0x4f4   : > { %v1178_v38 = vpop.permute.xlu1 %1177 }
 0x4f6   : > { %v1893_v24 = vpop.eup %1892 }
 0x4f7   : > { %v1031_v25 = vsel %vm512_vm2, %v1893_v24, 0.0 }
 0x4f8   : > { %v1895_v26 = vpop.eup %1894  ;;  %1032 = vadd.xlane.f32.xlu0 %v1031_v25 }
 0x4f9   : > { %v1028_v27 = vsel %vm512_vm2, %v1895_v26, 0.0 }
 0x4fc   : > { %1029 = vadd.xlane.f32.xlu0 %v1028_v27 }
 0x512   : > { %1062 = vrot.lane.b32.xlu0 %v2167_v10, %s2039_s18  ;;  %s2428_s18 = scalar_lea.hbm %s2513_s5, %s1694_s19 }
 0x516   : > { %1175 = vrot.lane.b32.xlu0 %v2167_v10, %s2041_s10  ;;  %s2324_s10 = scalar_lea.vmem %s2514_s6, %s1693_s28 }
 0x581   : > { %v1033_v28 = vpop.xlane.xlu0 %1032 }
 0x582   : > { %1896 = vrcp.f32 %v1033_v28 }
 0x585   : > { %v1030_v29 = vpop.xlane.xlu0 %1029 }
 0x586   : > { %1898 = vrcp.f32 %v1030_v29 }
 0x587   : > { %1900 = vpow2.f32 %v398_v41 }
 0x588   : > { %1902 = vpow2.f32 %v400_v43 }
 0x589   : > { %v1063_v30 = vpop.permute.xlu0 %1062 }
 0x58a   : > { %1782 = vmatprep.subr.mxu1 %v1063_v30 }
 0x58b   : > { %1783 = vmatpush3.msra.mxu1 %v1063_v30 }
 0x58c   : > { %1787 = vmatprep.subr.msk.mxu1 %vm426_vm1, %v1182_v31 }
 0x58d   : > { %v1176_v36 = vpop.permute.xlu0 %1175 }
 0x58f   : > { %v1897_v32 = vpop.eup %1896 }
 0x590   : > { %v1037_v33 = vmul.f32 %v1897_v32, %v1893_v24 }
 0x592   : > { %1666 = vst.msk [vmem:[%s2211_s20 + $0x28] sm:$0xff] %vm512_vm2, %v1037_v33 }
 0x593   : > { %v1899_v34 = vpop.eup %1898 }
 0x594   : > { %v1036_v35 = vmul.f32 %v1899_v34, %v1895_v26  ;;  %v1901_v44 = vpop.eup %1900 }
 0x595   : > { %v402_v45 = vadd.f32 1.0, %v1901_v44  ;;  %v1903_v46 = vpop.eup %1902 }
 0x596   : > { %1784 = vmatprep.mubr.msk.f32.mxu1 %vm512_vm2, %v1036_v35  ;;  %1665 = vst.msk [vmem:[%s2211_s20 + $0x20] sm:$0xff] %vm512_vm2, %v1036_v35  ;;  %v403_v47 = vadd.f32 1.0, %v1903_v46 }
 0x597   : > { %1785 = vmatmul.mubr.msk.f32.vlgmr.msra.gmra.mxu1 %vm512_vm2, %v1037_v33  ;;  %1904 = vrcp.f32 %v402_v45 }
 0x598   : > { %1788 = vmatpush3.xpose.msk.msra.mxu1 %vm426_vm1, %v1182_v31  ;;  %1791 = vmatprep.mubr.msk.f32.mxu1 %vm426_vm1, %v1176_v36  ;;  %1906 = vrcp.f32 %v403_v47 }
 0x599   : > { %1789 = vmatprep.subr.msk.mxu1 %vm426_vm1, %v1180_v37 }
 0x59c   : > { %1790 = vmatpush3.xpose.msk.msra.mxu1 %vm426_vm1, %v1180_v37 }
 0x59f   : > { %1792 = vmatmul.mubr.msk.f32.vlgmr.msra.gmra.mxu1 %vm426_vm1, %v1178_v38 }
 0x5a4   : > { %v1905_v48 = vpop.eup %1904 }
 0x5a5   : > { %v408_v49 = vadd.f32 1e-05, %v1905_v48  ;;  %v1907_v50 = vpop.eup %1906 }
 0x5a6   : > { %v409_v52 = vadd.f32 1e-05, %v1907_v50 }
 0x5a7   : > { %v410_v51 = vmul.f32 1.0986123, %v408_v49 }
 0x5a8   : > { %v411_v54 = vmul.f32 1.0986123, %v409_v52 }
 0x5a9   : > { %v412_v53 = vmul.f32 1.442695, %v410_v51 }
 0x5aa   : > { %v414_v55 = vmul.f32 1.442695, %v411_v54 }
 0x5ab   : > { %1908 = vpow2.f32 %v412_v53 }
 0x5ac   : > { %1910 = vpow2.f32 %v414_v55 }
 0x5b8   : > { %v1909_v58 = vpop.eup %1908 }
 0x5b9   : > { %v2273_v0 = vadd.f32 -1.0, %v1909_v58  ;;  %v1911_v1 = vpop.eup %1910 }
 0x5ba   : > { %v2277_v3 = vadd.f32 -1.0, %v1911_v1 }
 0x5bb   : > { %1912 = vrcp.f32 %v2273_v0 }
 0x5bc   : > { %1914 = vrcp.f32 %v2277_v3 }
 0x5c8   : > { %v1913_v4 = vpop.eup %1912 }
 0x5c9   : > { %v2282_v5 = vmul.f32 %v1913_v4, %v1913_v4  ;;  %v1915_v6 = vpop.eup %1914 }
 0x5ca   : > { %v2285_v11 = vmul.f32 %v1915_v6, %v1915_v6  ;;  %v2288_v12 = vmul.f32 0.3989423, %v1915_v6 }
 0x657   : > { %v2270_v56 = vpop.f32.mrf.mxu1 }
 0x659   : > { %v1140_v57 = vpop.f32.mrf.mxu1 }
 0x65f   : > { %v1793_v59 = vpop.f32.mrf.mxu1 }
 0x660   : > { %v1267_v60 = vmul.f32 0.35355338, %v1793_v59 }
 0x661   : > { %v1257_v61 = vpop.f32.mrf.mxu1 }
 0x662   : > { %v1266_v62 = vmul.f32 0.35355338, %v1257_v61  ;;  %v1271_v63 = vsel %vm512_vm2, %v1267_v60, -inf }
 0x663   : > { %1272 = vmax.xlane.f32.xlu1 %v1271_v63 }
 0x664   : > { %v1268_v2 = vsel %vm512_vm2, %v1266_v62, -inf }
 0x665   : > { %1269 = vmax.xlane.f32.xlu0 %v1268_v2 }
 0x674   : > { %1316 = vrot.lane.b32.xlu1 %v2165_v8, %s2043_s11  ;;  %v2295_v8 = vmul.f32 0.3989423, %v1913_v4 }
 0x678   : > { %541 = vperm.xlu1 %1868, %v2282_v5  }
 0x67c   : > { %546 = vperm.xlu1 %1868, %v2285_v11  }
 0x680   : > { %562 = vperm.xlu1 %1868, %v2288_v12  }
 0x684   : > { %662 = vrot.lane.b32.xlu1 %v2273_v0, %s2044_s12 }
 0x685   : > { %1870 = vset.pattern.permute.xlu1 %v2045_v13 }
 0x688   : > { %787 = vperm.xlu1 %1870, %v2282_v5  }
 0x68c   : > { %801 = vperm.xlu1 %1870, %v2295_v8  }
 0x690   : > { %805 = vperm.xlu1 %1870, %v2288_v12  }
 0x694   : > { %901 = vrot.lane.b32.xlu1 %v2242_v7, %s2515_s13  ;;  %v380_v7 = vlaneseq }
 0x695   : > { %1873 = vset.pattern.permute.xlu1 %v2047_v14 }
 0x696   : > { %v381_v16 = vshrl.u32 %v380_v7, 7  ;;  %v386_v18 = vand.u32 127, %v380_v7 }
 0x698   : > { %916 = vrot.lane.b32.xlu1 %v2277_v3, %s2048_s14  ;;  %v382_v17 = vadd.s32 8, %v381_v16  ;;  %v387_v20 = vcvt.s32.f32 %v386_v18  ;;  %v383_v32 = vcvt.s32.f32 %v381_v16 }
 0x69a   : > { %v384_v19 = vcvt.s32.f32 %v382_v17  ;;  %v388_v35 = vsub.f32 %v383_v32, %v387_v20 }
 0x69c   : > { %1043 = vperm.xlu1 %1873, %v2285_v11   ;;  %v389_v23 = vsub.f32 %v384_v19, %v387_v20  ;;  %v390_v39 = vmul.f32 %v388_v35, %v388_v35 }
 0x69e   : > { %v391_v29 = vmul.f32 %v389_v23, %v389_v23  ;;  %v2332_v43 = vmul.f32 -0.5, %v390_v39 }
 0x6a0   : > { %1053 = vperm.xlu1 %1873, %v2295_v8   ;;  %v2315_v31 = vmul.f32 -0.5, %v391_v29 }
 0x6a4   : > { %1151 = vrot.lane.b32.xlu1 %v1140_v57, %s2049_s16 }
 0x6a5   : > { %1874 = vset.pattern.permute.xlu1 %v2050_v15 }
 0x6a8   : > { %1166 = vrot.lane.b32.xlu1 %v2273_v0, %s2051_s26 }
 0x6ac   : > { %1291 = vperm.xlu1 %1874, %v2282_v5  }
 0x6b0   : > { %1305 = vperm.xlu1 %1874, %v2295_v8  }
 0x6b4   : > { %1309 = vperm.xlu1 %1874, %v2288_v12  }
 0x6ec   : > { %v1273_v21 = vpop.xlane.xlu1 %1272 }
 0x6ed   : > { %v1275_v22 = vsub.f32 %v1267_v60, %v1273_v21 }
 0x6ee   : > { %v1270_v24 = vpop.xlane.xlu0 %1269 }
 0x6ef   : > { %v1278_v25 = vmul.f32 1.442695, %v1275_v22  ;;  %v1274_v26 = vsub.f32 %v1266_v62, %v1270_v24 }
 0x6f0   : > { %v1317_v27 = vpop.permute.xlu1 %1316 }
 0x6f1   : > { %1916 = vpow2.f32 %v1278_v25  ;;  %v1276_v28 = vmul.f32 1.442695, %v1274_v26  ;;  %1794 = vmatprep.subr.mxu0 %v1317_v27 }
 0x6f2   : > { %1795 = vmatpush3.msra.mxu0 %v1317_v27 }
 0x6f3   : > { %1918 = vpow2.f32 %v1276_v28 }
 0x6f4   : > { %v2313_v30 = vpop.permute.xlu1 %541 }
 0x6f8   : > { %v547_v33 = vpop.permute.xlu1 %546 }
 0x6f9   : > { %v550_v34 = vmul.f32 %v547_v33, %v2315_v31 }
 0x6fb   : > { %v553_v36 = vmul.f32 1.442695, %v550_v34 }
 0x6fc   : > { %v563_v37 = vpop.permute.xlu1 %562 }
 0x6fd   : > { %1920 = vpow2.f32 %v553_v36 }
 0x6fe   : > { %v2319_v38 = vpop.eup %1916 }
 0x6ff   : > { %v1283_v40 = vsel %vm512_vm2, %v2319_v38, 0.0 }
 0x700   : > { %v2328_v41 = vpop.eup %1918  ;;  %1284 = vadd.xlane.f32.xlu0 %v1283_v40  ;;  %v663_v42 = vpop.permute.xlu1 %662 }
 0x701   : > { %669 = vst.msk [vmem:[%s2324_s10] sm:$0xff] %vm668_vm3, %v663_v42  ;;  %v1280_v44 = vsel %vm512_vm2, %v2328_v41, 0.0 }
 0x704   : > { %1281 = vadd.xlane.f32.xlu0 %v1280_v44  ;;  %v788_v45 = vpop.permute.xlu1 %787 }
 0x705   : > { %v794_v46 = vmul.f32 %v788_v45, %v2332_v43 }
 0x707   : > { %v796_v47 = vmul.f32 1.442695, %v794_v46 }
 0x708   : > { %v802_v48 = vpop.permute.xlu1 %801 }
 0x709   : > { %1922 = vpow2.f32 %v796_v47 }
 0x70a   : > { %v1921_v49 = vpop.eup %1920 }
 0x70b   : > { %v566_v50 = vmul.f32 %v1921_v49, %v563_v37 }
 0x70c   : > { %v2337_v51 = vpop.permute.xlu1 %805 }
 0x70d   : > { %659 = vst.msk [vmem:[%s2341_s15 + $0x8] sm:$0xff] %vm512_vm2, %v566_v50 }
 0x710   : > { %v902_v52 = vpop.permute.xlu1 %901 }
 0x711   : > { %907 = vst.msk [vmem:[%s2236_s29 + $0x8] sm:$0xff] %vm905_vm4, %v902_v52 }
 0x714   : > { %v917_v53 = vpop.permute.xlu1 %916 }
 0x715   : > { %1658 = vst.msk [vmem:[%s2324_s10 + $0x18] sm:$0xff] %vm668_vm3, %v917_v53 }
 0x716   : > { %v1923_v54 = vpop.eup %1922 }
 0x717   : > { %v808_v55 = vmul.f32 %v1923_v54, %v802_v48 }
 0x718   : > { %v1044_v57 = vpop.permute.xlu1 %1043 }
 0x719   : > { %1655 = vst.msk [vmem:[%s2341_s15 + $0x10] sm:$0xff] %vm512_vm2, %v808_v55  ;;  %v1047_v7 = vmul.f32 %v1044_v57, %v2315_v31 }
 0x71a   : > { %1314 = vrot.lane.b32.xlu0 %v2167_v10, %s2043_s11  ;;  %s1459_s11 = sshll.u32 %s2211_s20, 4  ;;  %s2423_s11 = int_to_ptr.vmem [resolvable:$true] %s1459_s11 }
 0x71b   : > { %v1050_v18 = vmul.f32 1.442695, %v1047_v7 }
 0x71c   : > { %v2353_v58 = vpop.permute.xlu1 %1053 }
 0x71e   : > { %557 = vperm.xlu0 %1869, %v2295_v8  }
 0x720   : > { %v1152_v59 = vpop.permute.xlu1 %1151 }
 0x722   : > { %664 = vrot.lane.b32.xlu0 %v2277_v3, %s2044_s12 }
 0x723   : > { %1871 = vset.pattern.permute.xlu0 %v2045_v13 }
 0x724   : > { %v1167_v60 = vpop.permute.xlu1 %1166 }
 0x725   : > { %1669 = vst.msk [vmem:[%s2324_s10 + $0x20] sm:$0xff] %vm668_vm3, %v1167_v60 }
 0x726   : > { %791 = vperm.xlu0 %1871, %v2285_v11  }
 0x728   : > { %v1292_v61 = vpop.permute.xlu1 %1291 }
 0x729   : > { %v1298_v62 = vmul.f32 %v1292_v61, %v2332_v43 }
 0x72a   : > { %899 = vrot.lane.b32.xlu0 %v2244_v9, %s2515_s13  ;;  %v549_v9 = vmul.f32 %v2313_v30, %v2332_v43  ;;  %s1940_s13 = scalar_lea.vmem %s2423_s11, 1024 }
 0x72b   : > { %v1300_v10 = vmul.f32 1.442695, %v1298_v62  ;;  %1872 = vset.pattern.permute.xlu0 %v2047_v14  ;;  %p1941_p11 = scmp.ne.s32.totalorder %s2423_s11, %s1940_s13 }
 0x72c   : > { %v1306_v1 = vpop.permute.xlu1 %1305  ;;  %v551_v4 = vmul.f32 1.442695, %v549_v9 }
 0x72d   : > { %1924 = vpow2.f32 %v1300_v10  ;;  %p1942_p12 = pnand %p1941_p11, %p2130_p5 }
 0x72e   : > { %914 = vrot.lane.b32.xlu0 %v2273_v0, %s2048_s14 }
 0x72f   : > { %p1943_p13 = pneg %p1942_p12 }
 0x732   : > { %1039 = vperm.xlu0 %1872, %v2282_v5  }
 0x736   : > { %1057 = vperm.xlu0 %1872, %v2288_v12  }
 0x73a   : > { %v1925_v63 = vpop.eup %1924  ;;  %1153 = vrot.lane.b32.xlu0 %v2270_v56, %s2049_s16  ;;  %s2421_s16 = scalar_lea.hbm %s2512_s4, %s1694_s19 }
 0x73b   : > { %v1312_v2 = vmul.f32 %v1925_v63, %v1306_v1  ;;  %1875 = vset.pattern.permute.xlu0 %v2050_v15 }
 0x73d   : > { %1679 = vst.msk [vmem:[%s2341_s15 + $0x30] sm:$0xff] %vm512_vm2, %v1312_v2 }
 0x73e   : > { %1168 = vrot.lane.b32.xlu0 %v2277_v3, %s2051_s26 }
 0x742   : > { %1295 = vperm.xlu0 %1875, %v2285_v11  }
 0x789   : > { %v1285_v5 = vpop.xlane.xlu0 %1284 }
 0x78a   : > { %1926 = vrcp.f32 %v1285_v5 }
 0x78b   : > { %1928 = vpow2.f32 %v551_v4 }
 0x78d   : > { %v1282_v56 = vpop.xlane.xlu0 %1281 }
 0x78e   : > { %1930 = vrcp.f32 %v1282_v56 }
 0x78f   : > { %1932 = vpow2.f32 %v1050_v18 }
 0x791   : > { %v1315_v6 = vpop.permute.xlu0 %1314 }
 0x792   : > { %1796 = vmatprep.subr.mxu0 %v1315_v6 }
 0x793   : > { %1797 = vmatpush3.msra.mxu0 %v1315_v6 }
 0x797   : > { %v1927_v12 = vpop.eup %1926 }
 0x798   : > { %v1289_v13 = vmul.f32 %v1927_v12, %v2319_v38  ;;  %v1929_v11 = vpop.eup %1928 }
 0x799   : > { %v558_v8 = vpop.permute.xlu0 %557 }
 0x79a   : > { %v565_v14 = vmul.f32 %v1929_v11, %v558_v8  ;;  %1678 = vst.msk [vmem:[%s2211_s20 + $0x38] sm:$0xff] %vm512_vm2, %v1289_v13 }
 0x79b   : > { %v1931_v15 = vpop.eup %1930 }
 0x79c   : > { %658 = vst.msk [vmem:[%s2341_s15] sm:$0xff] %vm512_vm2, %v565_v14  ;;  %v1288_v16 = vmul.f32 %v1931_v15, %v2328_v41  ;;  %v1933_v27 = vpop.eup %1932  ;;  %v1310_v41 = vpop.permute.xlu1 %1309 }
 0x79d   : > { %v665_v17 = vpop.permute.xlu0 %664 }
 0x79e   : > { %670 = vst.msk [vmem:[%s2324_s10 + $0x8] sm:$0xff] %vm668_vm3, %v665_v17  ;;  %1798 = vmatprep.mubr.msk.f32.mxu0 %vm512_vm2, %v1288_v16 }
 0x79f   : > { %1677 = vst.msk [vmem:[%s2211_s20 + $0x30] sm:$0xff] %vm512_vm2, %v1288_v16  ;;  %1799 = vmatmul.mubr.msk.f32.vlgmr.msra.gmra.mxu0 %vm512_vm2, %v1289_v13  ;;  %s1944_s20 = sshll.u32 %s2052_s25, 4  ;;  %s1945_s20 = int_to_ptr.vmem [resolvable:$false] %s1944_s20 }
 0x7a0   : > { %s1946_s12 = scalar_lea.vmem %s1945_s20, 2048  ;;  %p1947_p0 = scmp.lt.s32.totalorder %s2423_s11, %s1945_s20 }
 0x7a1   : > { %v792_v19 = vpop.permute.xlu0 %791  ;;  %p1948_p1 = scmp.lt.s32.totalorder %s1946_s12, %s1940_s13 }
 0x7a2   : > { %v795_v20 = vmul.f32 %v792_v19, %v2315_v31 }
 0x7a3   : > { %p1949_p2 = por %p1948_p1, %p1947_p0 }
 0x7a4   : > { %v798_v21 = vmul.f32 1.442695, %v795_v20 }
 0x7a5   : > { %v900_v22 = vpop.permute.xlu0 %899  ;;  %p1950_p3 = pnand %p1949_p2, %p1943_p13 }
 0x7a6   : > { %1934 = vpow2.f32 %v798_v21  ;;  %906 = vst.msk [vmem:[%s2236_s29] sm:$0xff] %vm905_vm4, %v900_v22 }
 0x7a7   : > { %1158 = vst.msk [vmem:[%s2236_s29] sm:$0xff] %vm1157_vm5, %v1152_v59 }
 0x7a9   : > { %v915_v23 = vpop.permute.xlu0 %914 }
 0x7aa   : > { %1657 = vst.msk [vmem:[%s2324_s10 + $0x10] sm:$0xff] %vm668_vm3, %v915_v23 }
 0x7ad   : > { %v1040_v24 = vpop.permute.xlu0 %1039 }
 0x7ae   : > { %v1046_v25 = vmul.f32 %v1040_v24, %v2332_v43 }
 0x7b0   : > { %v1048_v26 = vmul.f32 1.442695, %v1046_v25 }
 0x7b1   : > { %v1058_v28 = vpop.permute.xlu0 %1057 }
 0x7b2   : > { %1936 = vpow2.f32 %v1048_v26  ;;  %v1061_v29 = vmul.f32 %v1933_v27, %v1058_v28 }
 0x7b3   : > { %v1935_v30 = vpop.eup %1934 }
 0x7b4   : > { %v809_v32 = vmul.f32 %v1935_v30, %v2337_v51  ;;  %1668 = vst.msk [vmem:[%s2341_s15 + $0x28] sm:$0xff] %vm512_vm2, %v1061_v29 }
 0x7b5   : > { %v1154_v33 = vpop.permute.xlu0 %1153 }
 0x7b6   : > { %1656 = vst.msk [vmem:[%s2341_s15 + $0x18] sm:$0xff] %vm512_vm2, %v809_v32 }
 0x7b7   : > { %1159 = vst.msk [vmem:[%s2236_s29 + $0x8] sm:$0xff] %vm1157_vm5, %v1154_v33 }
 0x7b9   : > { %v1169_v34 = vpop.permute.xlu0 %1168 }
 0x7ba   : > { %1670 = vst.msk [vmem:[%s2324_s10 + $0x28] sm:$0xff] %vm668_vm3, %v1169_v34 }
 0x7bd   : > { %v1296_v35 = vpop.permute.xlu0 %1295 }
 0x7be   : > { %v1299_v36 = vmul.f32 %v1296_v35, %v2315_v31 }
 0x7bf   : > { %v1937_v37 = vpop.eup %1936 }
 0x7c0   : > { %v1060_v38 = vmul.f32 %v1937_v37, %v2353_v58  ;;  %v1302_v39 = vmul.f32 1.442695, %v1299_v36 }
 0x7c2   : > { %1667 = vst.msk [vmem:[%s2341_s15 + $0x20] sm:$0xff] %vm512_vm2, %v1060_v38  ;;  %1938 = vpow2.f32 %v1302_v39 }
 0x7cf   : > { %v1939_v40 = vpop.eup %1938 }
 0x7d0   : > { %v1313_v42 = vmul.f32 %v1939_v40, %v1310_v41 }
 0x7d2   : > { %1680 = vst.msk [vmem:[%s2341_s15 + $0x38] sm:$0xff] %vm512_vm2, %v1313_v42 }
 0x7d3   : > { %1953 = shalt.err (!%p1950_p3)
}
 0x7d4   : > { %s1954_s19 = scalar_lea.hbm %s2421_s16, 1024  ;;  %s1958_s28 = scalar_lea.hbm %s2512_s4, 2048 }
 0x7d5   : > { %p1955_p4 = scmp.ne.s32.totalorder %s2421_s16, %s1954_s19  ;;  %p1959_p9 = scmp.lt.s32.totalorder %s2421_s16, %s2512_s4 }
 0x7d6   : > { %p1960_p10 = scmp.lt.s32.totalorder %s1958_s28, %s1954_s19 }
 0x7d7   : > { %p1956_p7 = pnand %p1955_p4, %p2130_p5 }
 0x7d8   : > { %p1961_p11 = por %p1960_p10, %p1959_p9 }
 0x7d9   : > { %p1957_p8 = pneg %p1956_p7 }
 0x7db   : > { %p1962_p12 = pnand %p1961_p11, %p1957_p8 }
 0x7dd   : > { %1965 = shalt.err (!%p1962_p12)
}
 0x7de   : > { %s2053_s13 = smov 128   ;;  %s2519_s20 = smov 8  }
 0x7df   : > { %s2520_s12 = scalar_lea.sflag [#allocation3], %s2206_s17  ;;  %s1475_s9 = sshll.u32 %s2341_s15, 4  ;;  %s2457_s9 = int_to_ptr.vmem [resolvable:$true] %s1475_s9 }
 0x7e0   : > { %1801 = dma.vmem_to_hbm [thread:$0]  (%p2130_p5), %s2423_s11, 1024, %s2421_s16, %s2520_s12, %s2053_s13, %s2053_s13, %s2519_s20  }
 0x7e1   : > { %s1438_s19 = scalar_lea.sflag [#allocation5], %s2206_s17  ;;  %s1966_s14 = scalar_lea.vmem %s2457_s9, 1024 }
 0x7e2   : > { %p1967_p13 = scmp.ne.s32.totalorder %s2457_s9, %s1966_s14  ;;  %s2054_s26 = smov [#allocation4]  }
 0x7e3   : > { %s1970_s28 = sshll.u32 %s2054_s26, 4  ;;  %s1971_s28 = int_to_ptr.vmem [resolvable:$false] %s1970_s28 }
 0x7e4   : > { %p1968_p0 = pnand %p1967_p13, %p2130_p5  ;;  %s1972_s25 = scalar_lea.vmem %s1971_s28, 2048 }
 0x7e5   : > { %p1973_p2 = scmp.lt.s32.totalorder %s2457_s9, %s1971_s28  ;;  %p1974_p3 = scmp.lt.s32.totalorder %s1972_s25, %s1966_s14 }
 0x7e6   : > { %p1969_p1 = pneg %p1968_p0 }
 0x7e7   : > { %p1975_p4 = por %p1974_p3, %p1973_p2 }
 0x7e9   : > { %p1976_p7 = pnand %p1975_p4, %p1969_p1 }
 0x7eb   : > { %1979 = shalt.err (!%p1976_p7)
}
 0x7ec   : > { %s1980_s15 = scalar_lea.hbm %s2428_s18, 1024  ;;  %s1984_s16 = scalar_lea.hbm %s2513_s5, 2048 }
 0x7ed   : > { %p1981_p8 = scmp.ne.s32.totalorder %s2428_s18, %s1980_s15  ;;  %p1985_p11 = scmp.lt.s32.totalorder %s2428_s18, %s2513_s5 }
 0x7ee   : > { %p1986_p12 = scmp.lt.s32.totalorder %s1984_s16, %s1980_s15 }
 0x7ef   : > { %p1982_p9 = pnand %p1981_p8, %p2130_p5 }
 0x7f0   : > { %p1987_p13 = por %p1986_p12, %p1985_p11 }
 0x7f1   : > { %p1983_p10 = pneg %p1982_p9 }
 0x7f3   : > { %p1988_p0 = pnand %p1987_p13, %p1983_p10 }
 0x7f5   : > { %1991 = shalt.err (!%p1988_p0)
}
 0x7f6   : > { %1802 = dma.vmem_to_hbm [thread:$0]  (%p2130_p5), %s2457_s9, 1024, %s2428_s18, %s1438_s19, %s2053_s13, %s2053_s13, %s2519_s20   ;;  %vm1409_vm6 = vcmask 261312  }
 0x7f7   : > { %s2055_s14 = smov 24   ;;  %s2056_s28 = smov 29  }
 0x85f   : > { %v1800_v31 = vpop.f32.mrf.mxu0 }
 0x860   : > { %1405 = vrot.lane.b32.xlu1 %v1800_v31, %s2055_s14 }
 0x861   : > { %v1392_v43 = vpop.f32.mrf.mxu0 }
 0x862   : > { %1403 = vrot.lane.b32.xlu0 %v1392_v43, %s2055_s14 }
 0x864   : > { %1420 = vrot.lane.b32.xlu1 %v2277_v3, %s2056_s28 }
 0x866   : > { %1418 = vrot.lane.b32.xlu0 %v2273_v0, %s2056_s28 }
 0x8d2   : > { %v1406_v44 = vpop.permute.xlu1 %1405 }
 0x8d3   : > { %1411 = vst.msk [vmem:[%s2236_s29 + $0x8] sm:$0xff] %vm1409_vm6, %v1406_v44 }
 0x8d4   : > { %v1404_v45 = vpop.permute.xlu0 %1403 }
 0x8d5   : > { %1410 = vst.msk [vmem:[%s2236_s29] sm:$0xff] %vm1409_vm6, %v1404_v45 }
 0x8d6   : > { %v1421_v46 = vpop.permute.xlu1 %1420 }
 0x8d7   : > { %1682 = vst.msk [vmem:[%s2324_s10 + $0x38] sm:$0xff] %vm668_vm3, %v1421_v46 }
 0x8d8   : > { %v1419_v47 = vpop.permute.xlu0 %1418 }
 0x8d9   : > { %1681 = vst.msk [vmem:[%s2324_s10 + $0x30] sm:$0xff] %vm668_vm3, %v1419_v47 }
 0x8da PF: > { %p1812_p5 = scmp.ge.s32.totalorder %s2030_s24, 2  ;;  %s1501_s7 = sand.u32 1, %s2018_s21  }
 0x8db   : > { %s1502_s18 = scalar_lea.sflag [#allocation3], %s1501_s7 }
 0x8dc   : > { %p1806_p1 = pnand %p1812_p5, %p2134_p6 }
 0x8de   : > { %p1807_p2 = pneg %p1806_p1 }
 0x8e0   : > { %2009 = dma.done.wait (%p1807_p2), %s1502_s18, 1024  }
 0x8e1   : > { %2011 = vsyncadd (%p1807_p2), %s1502_s18, 4294966272  ;;  %s1511_s13 = scalar_lea.sflag [#allocation5], %s1501_s7 }
 0x8e2   : > { %2013 = dma.done.wait (%p1807_p2), %s1511_s13, 1024  }
 0x8e3   : > { %2015 = vsyncadd (%p1807_p2), %s1511_s13, 4294966272  ;;  %p20_p3 = scmp.ge.s32.totalorder %s2117_s27, 4   ;;  %s2521_s21 = smov %s2022_s22 }
 0x8e4   : > { %s2522_s22 = smov %s2026_s23  ;;  %s2523_s23 = smov %s2128_s30 }
 0x8e5   : > { %s2524_s24 = smov %s2117_s27  ;;  %22 = sbr.rel (!%p20_p3) target bundleno = 5 (0x5), region = 117 }
 0x8ea   :  { %1524 = vsyncpa [#allocation3], 1 }
 0x8eb   :  { %1526 = vsyncpa [#allocation3 + $0x1], 1 }
 0x8ec   :  { %1527 = vsyncpa [#allocation5], 1 }
 0x8ed   :  { %1529 = vsyncpa [#allocation5 + $0x1], 1 }

// kernel: anomaly_transformer_forward.11
= control target key start
LH: loop header
LB: loop body
LE: loop exit
PB: predicated region body
PF: predicated region fallthrough
CT: control target
= control target key end

     0   :  { %s508_s18 = smov 0   ;;  %s559_s0 = inlined_call_operand.vmem [shape: f32[2,16,32], index: 0, kind: input, shape index: {}]   ;;  %s560_s1 = inlined_call_operand.vmem [shape: f32[1,32], index: 1, kind: input, shape index: {}]   ;;  %s561_s2 = inlined_call_operand.vmem [shape: f32[1,32], index: 2, kind: input, shape index: {}]   ;;  %s562_s3 = inlined_call_operand.vmem [shape: f32[32,4], index: 3, kind: input, shape index: {}]   ;;  %s563_s4 = inlined_call_operand.vmem [shape: f32[1,4], index: 4, kind: input, shape index: {}]   ;;  %s564_s5 = inlined_call_operand.vmem [shape: f32[2,16,4], index: 5, kind: output, shape index: {}]  }
   0x1 LB: > { %s423_s19 = sadd.s32 4294967295, %s476_s18   ;;  %p427_p0 = scmp.ge.s32.totalorder %s476_s18, 1  ;;  %s476_s18 = sphi %s508_s18, %s15_s18  }
   0x2   : > { %p187_p1 = scmp.lt.s32.totalorder %s476_s18, 3 }
   0x4   : > { %p188_p2 = pnand %p427_p0, %p187_p1 }
   0x5   : > { %p215_p3 = scmp.lt.s32.totalorder (!%p188_p2), %s423_s19, 1 }
   0x6   : > { %191 = sbr.rel (%p188_p2) target bundleno = 525 (0x20d), region = 40 }
   0xb   : > { %s566_s19 = smov (!%p215_p3, %s423_s19), 1  ;;  %vm229_vm0 = vcmask 261120   ;;  %v276_v14 = vld [vmem:[%s562_s3 + $0x18] sm:$0xff]  ;;  %v275_v15 = vld [vmem:[%s562_s3 + $0x10] sm:$0xff]  ;;  %v274_v16 = vld [vmem:[%s562_s3 + $0x8] sm:$0xff]  ;;  %vm365_vm1 = vcmask 31744  }
   0xc   : > { %s439_s20 = sshll.u32 %s566_s19, 4  ;;  %447 = vmatprep.subr.mxu0 %v276_v14  ;;  %v273_v17 = vld [vmem:[%s562_s3] sm:$0xff] }
   0xd   : > { %s219_s23 = scalar_lea.vmem %s559_s0, %s439_s20  ;;  %448 = vmatpush3.msra.mxu0 %v276_v14  ;;  %v432_v25 = vld [vmem:[%s560_s1] ss:$0 sm:$0xff]  ;;  %s224_s15 = scalar_lea.vmem %s564_s5, %s439_s20 }
   0xe   : > { %v225_v0 = vld [vmem:[%s219_s23] sm:$0xff]  ;;  %v226_v1 = vld [vmem:[%s219_s23 + $0x8] sm:$0xff]  ;;  %449 = vmatprep.subr.mxu0 %v275_v15 }
   0xf   : > { %v230_v2 = vsel %vm229_vm0, %v225_v0, 0.0  ;;  %v233_v3 = vsel %vm229_vm0, %v226_v1, 0.0  ;;  %450 = vmatpush3.msra.mxu0 %v275_v15  ;;  %v433_v27 = vld [vmem:[%s561_s2] ss:$0 sm:$0xff] }
  0x10   : > { %231 = vadd.xlane.f32.xlu0 %v230_v2  ;;  %451 = vmatprep.subr.mxu0 %v274_v16  ;;  %v434_v34 = vld [vmem:[%s563_s4] ss:$0 sm:$0xff] }
  0x11   : > { %452 = vmatpush3.msra.mxu0 %v274_v16 }
  0x12   : > { %453 = vmatprep.subr.mxu0 %v273_v17 }
  0x13   : > { %454 = vmatpush3.msra.mxu0 %v273_v17 }
  0x14   : > { %234 = vadd.xlane.f32.xlu0 %v233_v3 }
  0x99   : > { %v232_v4 = vpop.xlane.xlu0 %231 }
  0x9a   : > { %v237_v5 = vmul.f32 0.03125, %v232_v4 }
  0x9c   : > { %v239_v6 = vsub.f32 %v225_v0, %v237_v5 }
  0x9d   : > { %v235_v7 = vpop.xlane.xlu0 %234 }
  0x9e   : > { %v238_v8 = vmul.f32 0.03125, %v235_v7  ;;  %v241_v9 = vmul.f32 %v239_v6, %v239_v6 }
  0xa0   : > { %v240_v10 = vsub.f32 %v226_v1, %v238_v8  ;;  %v243_v11 = vsel %vm229_vm0, %v241_v9, 0.0 }
  0xa1   : > { %244 = vadd.xlane.f32.xlu1 %v243_v11 }
  0xa2   : > { %v242_v12 = vmul.f32 %v240_v10, %v240_v10 }
  0xa4   : > { %v246_v13 = vsel %vm229_vm0, %v242_v12, 0.0 }
  0xa5   : > { %247 = vadd.xlane.f32.xlu1 %v246_v13 }
 0x12a   : > { %v245_v18 = vpop.xlane.xlu1 %244 }
 0x12b   : > { %v249_v19 = vmul.f32 0.03125, %v245_v18 }
 0x12d   : > { %v251_v20 = vadd.f32 1e-05, %v249_v19 }
 0x12e   : > { %v248_v21 = vpop.xlane.xlu1 %247 }
 0x12f   : > { %466 = vrsqrt.f32 %v251_v20  ;;  %v250_v22 = vmul.f32 0.03125, %v248_v21 }
 0x131   : > { %v252_v23 = vadd.f32 1e-05, %v250_v22 }
 0x133   : > { %468 = vrsqrt.f32 %v252_v23 }
 0x13c   : > { %v467_v24 = vpop.eup %466 }
 0x13d   : > { %v255_v26 = vmul.f32 %v467_v24, %v239_v6 }
 0x13f   : > { %v263_v28 = vmul.f32 %v432_v25, %v255_v26 }
 0x140   : > { %v469_v29 = vpop.eup %468 }
 0x141   : > { %v256_v30 = vmul.f32 %v469_v29, %v240_v10  ;;  %v271_v31 = vadd.f32 %v433_v27, %v263_v28 }
 0x143   : > { %v264_v32 = vmul.f32 %v432_v25, %v256_v30  ;;  %455 = vmatprep.mubr.msk.f32.mxu0 %vm229_vm0, %v271_v31 }
 0x145   : > { %v272_v33 = vadd.f32 %v433_v27, %v264_v32 }
 0x147   : > { %456 = vmatmul.mubr.msk.f32.vlgmr.msra.gmra.mxu0 %vm229_vm0, %v272_v33 }
 0x207   : > { %v457_v35 = vpop.f32.mrf.mxu0 }
 0x208   : > { %v362_v36 = vadd.f32 %v457_v35, %v434_v34 }
 0x209   : > { %v356_v37 = vpop.f32.mrf.mxu0 }
 0x20a   : > { %367 = vst.msk [vmem:[%s224_s15 + $0x8] sm:$0xff] %vm365_vm1, %v362_v36  ;;  %v357_v38 = vadd.f32 %v434_v34, %v356_v37 }
 0x20c   : > { %366 = vst.msk [vmem:[%s224_s15] sm:$0xff] %vm365_vm1, %v357_v38 }
 0x20d PF: > { %s15_s18 = sadd.s32 1, %s476_s18  }
 0x20e   : > { %p12_p4 = scmp.ge.s32.totalorder %s15_s18, 4  }
 0x210   :  { %14 = sbr.rel (!%p12_p4) target bundleno = 1 (0x1), region = 70 }

// kernel: anomaly_transformer_forward.8
= control target key start
LH: loop header
LB: loop body
LE: loop exit
PB: predicated region body
PF: predicated region fallthrough
CT: control target
= control target key end

     0   :  { %s854_s21 = smov 0   ;;  %s952_s0 = inlined_call_operand.vmem [shape: f32[2,16,32], index: 0, kind: input, shape index: {}]   ;;  %s953_s1 = inlined_call_operand.vmem [shape: f32[2,16,32], index: 1, kind: input, shape index: {}]   ;;  %s954_s2 = inlined_call_operand.vmem [shape: f32[32,32], index: 2, kind: input, shape index: {}]   ;;  %s955_s3 = inlined_call_operand.vmem [shape: f32[32,32], index: 3, kind: input, shape index: {}]   ;;  %s956_s4 = inlined_call_operand.vmem [shape: f32[32,32], index: 4, kind: input, shape index: {}]   ;;  %s957_s5 = inlined_call_operand.vmem [shape: f32[8,32], index: 5, kind: input, shape index: {}]   ;;  %s958_s6 = inlined_call_operand.vmem [shape: f32[2,16,32], index: 6, kind: output, shape index: {}]  }
   0x1 LB: > { %s711_s22 = sadd.s32 4294967295, %s817_s21   ;;  %p715_p0 = scmp.ge.s32.totalorder %s817_s21, 1  ;;  %s817_s21 = sphi %s854_s21, %s16_s21  }
   0x2   : > { %p222_p1 = scmp.lt.s32.totalorder %s817_s21, 3 }
   0x4   : > { %p223_p2 = pnand %p715_p0, %p222_p1 }
   0x5   : > { %p257_p3 = scmp.lt.s32.totalorder (!%p223_p2), %s711_s22, 1 }
   0x6   : > { %226 = sbr.rel (%p223_p2) target bundleno = 1257 (0x4e9), region = 44 }
   0xb   : > { %v286_v0 = vld [vmem:[%s954_s2 + $0x18] sm:$0xff]  ;;  %v285_v1 = vld [vmem:[%s954_s2 + $0x10] sm:$0xff]  ;;  %v284_v2 = vld [vmem:[%s954_s2 + $0x8] sm:$0xff]  ;;  %s960_s22 = smov (!%p257_p3, %s711_s22), 1  ;;  %vm291_vm0 = vcmask 261120  }
   0xc   : > { %758 = vmatprep.subr.mxu0 %v286_v0  ;;  %v283_v3 = vld [vmem:[%s954_s2] sm:$0xff]  ;;  %s874_s7 = sshll.u32 %s960_s22, 4  ;;  %v417_v27 = vld [vmem:[%s955_s3 + $0x18] sm:$0xff]  ;;  %v416_v28 = vld [vmem:[%s955_s3 + $0x10] sm:$0xff] }
   0xd   : > { %759 = vmatpush3.msra.mxu0 %v286_v0  ;;  %s266_s10 = scalar_lea.vmem %s953_s1, %s874_s7  ;;  %v722_v7 = vld [vmem:[%s957_s5] ss:$0 sm:$0xff]  ;;  %s261_s15 = scalar_lea.vmem %s952_s0, %s874_s7  ;;  %769 = vmatprep.subr.mxu1 %v417_v27  ;;  %v415_v29 = vld [vmem:[%s955_s3 + $0x8] sm:$0xff]  ;;  %v725_v38 = vld [vmem:[%s957_s5 + $0x3] ss:$0 sm:$0xff] }
   0xe   : > { %760 = vmatprep.subr.mxu0 %v285_v1  ;;  %v274_v4 = vld [vmem:[%s266_s10] sm:$0xff]  ;;  %v275_v5 = vld [vmem:[%s266_s10 + $0x8] sm:$0xff]  ;;  %770 = vmatpush3.msra.mxu1 %v417_v27  ;;  %v516_v47 = vld [vmem:[%s956_s4 + $0x18] sm:$0xff]  ;;  %s271_s25 = scalar_lea.vmem %s958_s6, %s874_s7 }
   0xf   : > { %761 = vmatpush3.msra.mxu0 %v285_v1  ;;  %766 = vmatprep.mubr.msk.f32.mxu0 %vm291_vm0, %v274_v4  ;;  %v272_v9 = vld [vmem:[%s261_s15] sm:$0xff]  ;;  %v273_v12 = vld [vmem:[%s261_s15 + $0x8] sm:$0xff]  ;;  %v515_v48 = vld [vmem:[%s956_s4 + $0x10] sm:$0xff] }
  0x10   : > { %762 = vmatprep.subr.mxu0 %v284_v2  ;;  %771 = vmatprep.subr.mxu1 %v416_v28  ;;  %v414_v30 = vld [vmem:[%s955_s3] sm:$0xff]  ;;  %v514_v49 = vld [vmem:[%s956_s4 + $0x8] sm:$0xff] }
  0x11   : > { %763 = vmatpush3.msra.mxu0 %v284_v2  ;;  %772 = vmatpush3.msra.mxu1 %v416_v28  ;;  %v726_v40 = vld [vmem:[%s957_s5 + $0x4] ss:$0 sm:$0xff]  ;;  %v727_v51 = vld [vmem:[%s957_s5 + $0x1] ss:$0 sm:$0xff]  ;;  %v730_v2 = vld [vmem:[%s957_s5 + $0x2] ss:$0 sm:$0xff] }
  0x12   : > { %764 = vmatprep.subr.mxu0 %v283_v3  ;;  %773 = vmatprep.subr.mxu1 %v415_v29  ;;  %v513_v50 = vld [vmem:[%s956_s4] sm:$0xff] }
  0x13   : > { %765 = vmatpush3.msra.mxu0 %v283_v3  ;;  %774 = vmatpush3.msra.mxu1 %v415_v29  ;;  %v733_v28 = vld [vmem:[%s957_s5 + $0x5] ss:$0 sm:$0xff] }
  0x14   : > { %767 = vmatmul.mubr.msk.f32.vlgmr.msra.gmra.mxu0 %vm291_vm0, %v275_v5  ;;  %775 = vmatprep.subr.mxu1 %v414_v30 }
  0x15   : > { %776 = vmatpush3.msra.mxu1 %v414_v30  ;;  %780 = vmatprep.subr.mxu0 %v516_v47 }
  0x16   : > { %781 = vmatpush3.msra.mxu0 %v516_v47 }
  0x17   : > { %782 = vmatprep.subr.mxu0 %v515_v48 }
  0x18   : > { %783 = vmatpush3.msra.mxu0 %v515_v48 }
  0x19   : > { %784 = vmatprep.subr.mxu0 %v514_v49 }
  0x1a   : > { %785 = vmatpush3.msra.mxu0 %v514_v49 }
  0x1b   : > { %786 = vmatprep.subr.mxu0 %v513_v50 }
  0x1c   : > { %787 = vmatpush3.msra.mxu0 %v513_v50 }
  0xd4   : > { %v768_v6 = vpop.f32.mrf.mxu0 }
  0xd5   : > { %v370_v10 = vadd.f32 %v768_v6, %v722_v7 }
  0xd6   : > { %v364_v8 = vpop.f32.mrf.mxu0 }
  0xd7   : > { %v365_v11 = vadd.f32 %v722_v7, %v364_v8  ;;  %v374_v15 = vadd.f32 %v370_v10, %v273_v12 }
  0xd9   : > { %v373_v13 = vadd.f32 %v365_v11, %v272_v9  ;;  %v378_v16 = vsel %vm291_vm0, %v374_v15, 0.0 }
  0xdb   : > { %v375_v14 = vsel %vm291_vm0, %v373_v13, 0.0 }
  0xdc   : > { %376 = vadd.xlane.f32.xlu0 %v375_v14 }
  0xe0   : > { %379 = vadd.xlane.f32.xlu0 %v378_v16 }
 0x165   : > { %v377_v17 = vpop.xlane.xlu0 %376 }
 0x166   : > { %v382_v18 = vmul.f32 0.03125, %v377_v17 }
 0x168   : > { %v384_v19 = vsub.f32 %v373_v13, %v382_v18 }
 0x169   : > { %v380_v20 = vpop.xlane.xlu0 %379 }
 0x16a   : > { %v383_v21 = vmul.f32 0.03125, %v380_v20  ;;  %v386_v22 = vmul.f32 %v384_v19, %v384_v19 }
 0x16c   : > { %v385_v23 = vsub.f32 %v374_v15, %v383_v21  ;;  %v388_v24 = vsel %vm291_vm0, %v386_v22, 0.0 }
 0x16d   : > { %389 = vadd.xlane.f32.xlu1 %v388_v24 }
 0x16e   : > { %v387_v25 = vmul.f32 %v385_v23, %v385_v23 }
 0x170   : > { %v391_v26 = vsel %vm291_vm0, %v387_v25, 0.0 }
 0x171   : > { %392 = vadd.xlane.f32.xlu1 %v391_v26 }
 0x1f6   : > { %v390_v31 = vpop.xlane.xlu1 %389 }
 0x1f7   : > { %v394_v32 = vmul.f32 0.03125, %v390_v31  ;;  %v734_v31 = vld [vmem:[%s957_s5 + $0x6] ss:$0 sm:$0xff] }
 0x1f9   : > { %v396_v33 = vadd.f32 1e-05, %v394_v32 }
 0x1fa   : > { %v393_v34 = vpop.xlane.xlu1 %392 }
 0x1fb   : > { %799 = vrsqrt.f32 %v396_v33  ;;  %v395_v35 = vmul.f32 0.03125, %v393_v34 }
 0x1fd   : > { %v397_v36 = vadd.f32 1e-05, %v395_v35 }
 0x1ff   : > { %801 = vrsqrt.f32 %v397_v36 }
 0x208   : > { %v800_v37 = vpop.eup %799 }
 0x209   : > { %v400_v39 = vmul.f32 %v800_v37, %v384_v19 }
 0x20b   : > { %v406_v41 = vmul.f32 %v725_v38, %v400_v39 }
 0x20c   : > { %v802_v42 = vpop.eup %801 }
 0x20d   : > { %v401_v43 = vmul.f32 %v802_v42, %v385_v23  ;;  %v412_v44 = vadd.f32 %v726_v40, %v406_v41 }
 0x20f   : > { %v407_v45 = vmul.f32 %v725_v38, %v401_v43  ;;  %777 = vmatprep.mubr.msk.f32.mxu1 %vm291_vm0, %v412_v44 }
 0x211   : > { %v413_v46 = vadd.f32 %v726_v40, %v407_v45 }
 0x213   : > { %778 = vmatmul.mubr.msk.f32.vlgmr.msra.gmra.mxu1 %vm291_vm0, %v413_v46 }
 0x2d3   : > { %v779_v52 = vpop.f32.mrf.mxu1 }
 0x2d4   : > { %v500_v53 = vadd.f32 %v779_v52, %v727_v51 }
 0x2d5   : > { %v494_v54 = vpop.f32.mrf.mxu1 }
 0x2d6   : > { %v506_v55 = vmul.f32 0.70710677, %v500_v53  ;;  %v495_v56 = vadd.f32 %v727_v51, %v494_v54  ;;  %v504_v63 = vmul.f32 0.5, %v500_v53 }
 0x2d8   : > { %803 = verf.f32 %v506_v55  ;;  %v505_v57 = vmul.f32 0.70710677, %v495_v56  ;;  %v503_v61 = vmul.f32 0.5, %v495_v56 }
 0x2da   : > { %805 = verf.f32 %v505_v57 }
 0x2e5   : > { %v804_v58 = vpop.eup %803 }
 0x2e6   : > { %v510_v60 = vadd.f32 1.0, %v804_v58 }
 0x2e7   : > { %v806_v59 = vpop.eup %805 }
 0x2e8   : > { %v509_v62 = vadd.f32 1.0, %v806_v59  ;;  %v512_v1 = vmul.f32 %v510_v60, %v504_v63 }
 0x2ea   : > { %v511_v0 = vmul.f32 %v509_v62, %v503_v61 }
 0x2ec   : > { %788 = vmatprep.mubr.msk.f32.mxu0 %vm291_vm0, %v511_v0 }
 0x2ed   : > { %789 = vmatmul.mubr.msk.f32.vlgmr.msra.gmra.mxu0 %vm291_vm0, %v512_v1 }
 0x3ad   : > { %v790_v3 = vpop.f32.mrf.mxu0 }
 0x3ae   : > { %v599_v4 = vadd.f32 %v790_v3, %v730_v2 }
 0x3af   : > { %v593_v5 = vpop.f32.mrf.mxu0 }
 0x3b0   : > { %v594_v6 = vadd.f32 %v730_v2, %v593_v5  ;;  %v603_v7 = vadd.f32 %v599_v4, %v413_v46 }
 0x3b2   : > { %v607_v8 = vsel %vm291_vm0, %v603_v7, 0.0  ;;  %v602_v9 = vadd.f32 %v594_v6, %v412_v44 }
 0x3b3   : > { %608 = vadd.xlane.f32.xlu1 %v607_v8 }
 0x3b4   : > { %v604_v10 = vsel %vm291_vm0, %v602_v9, 0.0 }
 0x3b5   : > { %605 = vadd.xlane.f32.xlu0 %v604_v10 }
 0x43c   : > { %v609_v11 = vpop.xlane.xlu1 %608 }
 0x43d   : > { %v611_v12 = vmul.f32 0.03125, %v609_v11 }
 0x43e   : > { %v606_v13 = vpop.xlane.xlu0 %605 }
 0x43f   : > { %v613_v14 = vsub.f32 %v603_v7, %v611_v12  ;;  %v610_v15 = vmul.f32 0.03125, %v606_v13 }
 0x441   : > { %v612_v16 = vsub.f32 %v602_v9, %v610_v15  ;;  %v615_v17 = vmul.f32 %v613_v14, %v613_v14 }
 0x443   : > { %v619_v18 = vsel %vm291_vm0, %v615_v17, 0.0  ;;  %v614_v19 = vmul.f32 %v612_v16, %v612_v16 }
 0x444   : > { %620 = vadd.xlane.f32.xlu1 %v619_v18 }
 0x445   : > { %v616_v20 = vsel %vm291_vm0, %v614_v19, 0.0 }
 0x446   : > { %617 = vadd.xlane.f32.xlu0 %v616_v20 }
 0x4cd   : > { %v621_v21 = vpop.xlane.xlu1 %620 }
 0x4ce   : > { %v623_v22 = vmul.f32 0.03125, %v621_v21 }
 0x4cf   : > { %v618_v23 = vpop.xlane.xlu0 %617 }
 0x4d0   : > { %v625_v24 = vadd.f32 1e-05, %v623_v22  ;;  %v622_v25 = vmul.f32 0.03125, %v618_v23 }
 0x4d2   : > { %807 = vrsqrt.f32 %v625_v24  ;;  %v624_v26 = vadd.f32 1e-05, %v622_v25 }
 0x4d4   : > { %809 = vrsqrt.f32 %v624_v26 }
 0x4df   : > { %v808_v27 = vpop.eup %807 }
 0x4e0   : > { %v629_v29 = vmul.f32 %v808_v27, %v613_v14 }
 0x4e1   : > { %v810_v30 = vpop.eup %809 }
 0x4e2   : > { %v635_v32 = vmul.f32 %v733_v28, %v629_v29  ;;  %v628_v33 = vmul.f32 %v810_v30, %v612_v16 }
 0x4e4   : > { %v641_v34 = vadd.f32 %v734_v31, %v635_v32  ;;  %v634_v35 = vmul.f32 %v733_v28, %v628_v33 }
 0x4e6   : > { %643 = vst.msk [vmem:[%s271_s25 + $0x8] sm:$0xff] %vm291_vm0, %v641_v34  ;;  %v640_v36 = vadd.f32 %v734_v31, %v634_v35 }
 0x4e8   : > { %642 = vst.msk [vmem:[%s271_s25] sm:$0xff] %vm291_vm0, %v640_v36 }
 0x4e9 PF: > { %s16_s21 = sadd.s32 1, %s817_s21  }
 0x4ea   : > { %p13_p4 = scmp.ge.s32.totalorder %s16_s21, 4  }
 0x4ec   :  { %15 = sbr.rel (!%p13_p4) target bundleno = 1 (0x1), region = 77 }

</bundles_post_ra>
